<compile_context>
chip_gen: v6e
topology: v6e:2x2x1
jax: 0.10.0
libtpu: 0.0.40
codegen_flags: <defaults>
</compile_context>

<pallas_src>
import functools

import jax
import jax.numpy as jnp
from jax.experimental import pallas as pl
from jax.experimental.pallas import tpu as pltpu

INPUT_SIZE = 16 * 2     # 32
OUTPUT_SIZE = 16 * 3    # 48
OUT_PAD = 128           # lane-dense padded output width (>= OUTPUT_SIZE)
LINEAR_SIZE = 128       # "hidden" (small stand-in for the default 1024)
NUM_STAGE = 2
BN_EPS = 1e-5


def _linear_model_kernel(x_ref, w1_ref, b1_ref,
                         stw_ref, stb_ref,
                         w2_ref, b2_ref, out_ref, *, num_stage):
    """Fused forward pass for one batch tile.

    x_ref   : (TB, IN)   bf16
    w1_ref  : (IN, H)    bf16 (BN scale folded in)   b1_ref : (1, H) f32
    stw_ref : (S, 2, H, H) bf16                      stb_ref: (S, 2, 1, H) f32
    w2_ref  : (H, OUT_PAD) bf16                      b2_ref : (1, OUT_PAD) f32
    out_ref : (TB, OUT_PAD) f32
    """
    bf16 = jnp.bfloat16

    # y = dropout(relu(bn1(w1(x))))  -- dropout is identity in eval mode
    y = jnp.dot(x_ref[...], w1_ref[...], preferred_element_type=jnp.float32)
    y = jnp.maximum(y + b1_ref[...], 0.0)

    # residual LinearBlocks (num_stage is static -> unrolled)
    for s in range(num_stage):
        t = jnp.dot(y.astype(bf16), stw_ref[s, 0],
                    preferred_element_type=jnp.float32)
        t = jnp.maximum(t + stb_ref[s, 0], 0.0)
        t = jnp.dot(t.astype(bf16), stw_ref[s, 1],
                    preferred_element_type=jnp.float32)
        t = jnp.maximum(t + stb_ref[s, 1], 0.0)
        y = y + t

    # output head (lane-padded to OUT_PAD); f32 writeback (bf16 optional).
    out = jnp.dot(y.astype(bf16), w2_ref[...],
                  preferred_element_type=jnp.float32)
    out_ref[...] = (out + b2_ref[...]).astype(out_ref.dtype)


def _pick_batch_tile(batch):
    # TB=256 fills the 256-wide v6e/v7x MXU, but only when the grid still has
    # >= 2 steps (keeps both v7x TensorCores busy).  TB=128 already matches
    # the v5e 4x128^2 MXU tile.
    return 256 if batch >= 512 else 128


def _auto_vmem_limit(params, tb, single_buffer_weights):
    """Resident footprint estimate + 2x headroom, clamped to [16, 48] MiB."""
    wfactor = 1 if single_buffer_weights else 2
    h = params["w1"].shape[1]
    weight_bytes = wfactor * sum(int(p.size) * p.dtype.itemsize
                                 for p in params.values())
    act_bytes = 3 * tb * h * 4                                   # y, t, temps (f32)
    io_bytes = 2 * (tb * INPUT_SIZE * 2 + tb * OUT_PAD * 4)      # 2-deep x / out tiles
    est = 2 * (weight_bytes + act_bytes + io_bytes)
    return int(min(max(est, 16 * 1024 * 1024), 48 * 1024 * 1024))


def linear_model_forward(x, params, *, batch_tile=None,
                         single_buffer_weights=True,
                         vmem_limit_bytes=None):
    """x: [B, INPUT_SIZE] float32 -> [B, OUTPUT_SIZE] float32."""
    B, in_f = x.shape
    assert in_f == INPUT_SIZE
    H = params["w1"].shape[1]
    S = params["stage_w"].shape[0]

    TB = _pick_batch_tile(B) if batch_tile is None else batch_tile
    B_pad = pl.cdiv(B, TB) * TB
    if B_pad != B:
        x = jnp.pad(x, ((0, B_pad - B), (0, 0)))
    # cast once in the wrapper: halves x HBM traffic, drops in-kernel cast
    x = x.astype(jnp.bfloat16)

    if vmem_limit_bytes is None:
        vmem_limit_bytes = _auto_vmem_limit(params, TB, single_buffer_weights)

    # Grid-invariant operands: constant block index -> fetched once.  With
    # single_buffer_weights, request 1-deep buffering (double-buffering a
    # never-changing block is pure wasted VMEM).
    def const(*shape):
        index_map = lambda i: (0,) * len(shape)
        if single_buffer_weights:
            return pl.BlockSpec(shape, index_map, pipeline_mode=pl.Buffered(1))
        return pl.BlockSpec(shape, index_map)

    weight_bytes = sum(int(p.size) * p.dtype.itemsize for p in params.values())
    cost = pl.CostEstimate(
        flops=2 * B_pad * (INPUT_SIZE * H + S * 2 * H * H + H * OUT_PAD),
        transcendentals=0,
        bytes_accessed=weight_bytes + B_pad * (INPUT_SIZE * 2 + OUT_PAD * 4),
    )

    kernel = functools.partial(_linear_model_kernel, num_stage=S)
    out = pl.pallas_call(
        kernel,
        out_shape=jax.ShapeDtypeStruct((B_pad, OUT_PAD), jnp.float32),
        grid_spec=pltpu.PrefetchScalarGridSpec(
            num_scalar_prefetch=0,
            grid=(B_pad // TB,),
            in_specs=[
                pl.BlockSpec((TB, INPUT_SIZE), lambda i: (i, 0)),   # x (bf16)
                const(INPUT_SIZE, H),                               # w1 (bf16)
                const(1, H),                                        # shift1
                const(S, 2, H, H),                                  # stage weights (bf16)
                const(S, 2, 1, H),                                  # stage shifts
                const(H, OUT_PAD),                                  # w2 (bf16, padded)
                const(1, OUT_PAD),                                  # b2 (padded)
            ],
            out_specs=pl.BlockSpec((TB, OUT_PAD), lambda i: (i, 0)),
        ),
        compiler_params=pltpu.CompilerParams(
            dimension_semantics=("parallel",),
            vmem_limit_bytes=vmem_limit_bytes,
        ),
        cost_estimate=cost,
    )(x, params["w1"], params["shift1"],
      params["stage_w"], params["stage_shift"],
      params["w2"], params["b2"])

    return out[:B, :OUTPUT_SIZE]


# ----------------------------------------------------------------------------
# Deterministic parameter construction (PyTorch-style uniform init; BN folded
# in f32 into the linear weight + bias; kernel weights cast to bf16).
# ----------------------------------------------------------------------------
def _linear_init(key, in_f, out_f):
    kw, kb = jax.random.split(key)
    bound = 1.0 / jnp.sqrt(in_f)
    # weight stored pre-transposed as [in_f, out_f]
    w = jax.random.uniform(kw, (in_f, out_f), jnp.float32, -bound, bound)
    b = jax.random.uniform(kb, (out_f,), jnp.float32, -bound, bound)
    return w, b


def _fold_bn_into_linear(w, b, gamma, beta, running_mean, running_var,
                         eps=BN_EPS):
    """BN(x@W + b) == x@(W*scale) + ((b - mean)*scale + beta)."""
    scale = gamma / jnp.sqrt(running_var + eps)
    w_folded = w * scale[None, :]
    shift = (b - running_mean) * scale + beta
    return w_folded, shift


def make_params(key, linear_size=LINEAR_SIZE, num_stage=NUM_STAGE):
    """Returns (kernel_params_bf16, reference_params_f32)."""
    H = linear_size
    keys = jax.random.split(key, 2 + 2 * num_stage)

    ones = jnp.ones((H,), jnp.float32)
    zeros = jnp.zeros((H,), jnp.float32)

    w1, b1 = _linear_init(keys[0], INPUT_SIZE, H)
    w1f, sh1 = _fold_bn_into_linear(w1, b1, ones, zeros, zeros, ones)

    stage_w, stage_sh = [], []
    for s in range(num_stage):
        wa, ba = _linear_init(keys[2 + 2 * s], H, H)
        wb, bb = _linear_init(keys[2 + 2 * s + 1], H, H)
        waf, sha = _fold_bn_into_linear(wa, ba, ones, zeros, zeros, ones)
        wbf, shb = _fold_bn_into_linear(wb, bb, ones, zeros, zeros, ones)
        stage_w.append(jnp.stack([waf, wbf]))                    # (2, H, H) f32
        stage_sh.append(jnp.stack([sha.reshape(1, -1),
                                   shb.reshape(1, -1)]))          # (2, 1, H)

    w2, b2 = _linear_init(keys[1], H, OUTPUT_SIZE)
    # pad the output head to a lane-dense 128 columns (zeros in the padding)
    w2p = jnp.zeros((H, OUT_PAD), jnp.float32).at[:, :OUTPUT_SIZE].set(w2)
    b2p = jnp.zeros((1, OUT_PAD), jnp.float32).at[0, :OUTPUT_SIZE].set(b2)

    stage_w_f32 = jnp.stack(stage_w)                              # (S, 2, H, H)
    stage_sh_f32 = jnp.stack(stage_sh)                            # (S, 2, 1, H)

    params = {
        "w1": w1f.astype(jnp.bfloat16),                # (IN, H) bf16
        "shift1": sh1.reshape(1, -1),                  # (1, H) f32
        "stage_w": stage_w_f32.astype(jnp.bfloat16),   # (S, 2, H, H) bf16
        "stage_shift": stage_sh_f32,                   # (S, 2, 1, H) f32
        "w2": w2p.astype(jnp.bfloat16),                # (H, OUT_PAD) bf16
        "b2": b2p,                                     # (1, OUT_PAD) f32
    }
    params_f32 = {
        "w1": w1f, "shift1": sh1.reshape(1, -1),
        "stage_w": stage_w_f32, "stage_shift": stage_sh_f32,
        "w2": w2p, "b2": b2p,
    }
    return params, params_f32


def _reference_forward(x, params, compute_dtype):
    """Pure-jnp reference (BN folded; dropout = identity, eval mode)."""
    f32 = jnp.float32
    y = jnp.maximum(jnp.dot(x.astype(compute_dtype),
                            params["w1"].astype(compute_dtype),
                            preferred_element_type=f32) + params["shift1"], 0.0)
    S = params["stage_w"].shape[0]
    for s in range(S):
        t = jnp.maximum(
            jnp.dot(y.astype(compute_dtype),
                    params["stage_w"][s, 0].astype(compute_dtype),
                    preferred_element_type=f32) + params["stage_shift"][s, 0], 0.0)
        t = jnp.maximum(
            jnp.dot(t.astype(compute_dtype),
                    params["stage_w"][s, 1].astype(compute_dtype),
                    preferred_element_type=f32) + params["stage_shift"][s, 1], 0.0)
        y = y + t
    out = jnp.dot(y.astype(compute_dtype), params["w2"].astype(compute_dtype),
                  preferred_element_type=f32) + params["b2"]
    return out[:, :OUTPUT_SIZE]


if __name__ == "__main__":
    key = jax.random.PRNGKey(0)
    kx, kp = jax.random.split(key)

    B = 256  # 2 grid steps at TB=128 -> both v7x TCs busy
    x = jax.random.normal(kx, (B, INPUT_SIZE), jnp.float32)
    params, params_f32 = make_params(kp)

    try:
        out = jax.block_until_ready(
            linear_model_forward(x, params, single_buffer_weights=True))
    except Exception:
        # Fallback for JAX versions without BlockSpec pipeline_mode / pl.Buffered.
        out = jax.block_until_ready(
            linear_model_forward(x, params, single_buffer_weights=False))

    # Tight check vs a reference with identical bf16-weight / f32-accum semantics.
    ref_bf16 = _reference_forward(x, params, jnp.bfloat16)
    # Loose check vs the pure-f32 (un-quantized) forward, i.e. PyTorch eval semantics.
    ref_f32 = _reference_forward(x, params_f32, jnp.float32)

    assert out.shape == (B, OUTPUT_SIZE)
    assert jnp.allclose(out, ref_bf16, atol=1e-2, rtol=1e-2), "mismatch vs bf16 reference"
    assert jnp.allclose(out, ref_f32, atol=5e-2, rtol=5e-2), "mismatch vs f32 reference"

    print("KERNEL_OK")
</pallas_src>

<mosaic_0001>
module attributes {stable_mosaic.version = 11 : i64} {
  func.func @_linear_model_kernel(%arg0: i32, %arg1: memref<128x32xbf16, #tpu.memory_space<vmem>>, %arg2: memref<32x128xbf16, #tpu.memory_space<vmem>>, %arg3: memref<1x128xf32, #tpu.memory_space<vmem>>, %arg4: memref<2x2x128x128xbf16, #tpu.memory_space<vmem>>, %arg5: memref<2x2x1x128xf32, #tpu.memory_space<vmem>>, %arg6: memref<128x128xbf16, #tpu.memory_space<vmem>>, %arg7: memref<1x128xf32, #tpu.memory_space<vmem>>, %arg8: memref<128x128xf32, #tpu.memory_space<vmem>>) attributes {dimension_semantics = [#tpu.dimension_semantics<parallel>], iteration_bounds = array<i64: 2>, scalar_prefetch = 0 : i64, scratch_operands = 0 : i64, tpu.core_type = #tpu.core_type<tc>, window_params = [{transform_indices = @transform_0, window_bounds = array<i64: 128, 32>}, {pipeline_mode = #tpu.pipeline_mode<synchronous>, transform_indices = @transform_1, window_bounds = array<i64: 32, 128>}, {pipeline_mode = #tpu.pipeline_mode<synchronous>, transform_indices = @transform_2, window_bounds = array<i64: 1, 128>}, {pipeline_mode = #tpu.pipeline_mode<synchronous>, transform_indices = @transform_3, window_bounds = array<i64: 2, 2, 128, 128>}, {pipeline_mode = #tpu.pipeline_mode<synchronous>, transform_indices = @transform_4, window_bounds = array<i64: 2, 2, 1, 128>}, {pipeline_mode = #tpu.pipeline_mode<synchronous>, transform_indices = @transform_5, window_bounds = array<i64: 128, 128>}, {pipeline_mode = #tpu.pipeline_mode<synchronous>, transform_indices = @transform_6, window_bounds = array<i64: 1, 128>}, {transform_indices = @transform_7, window_bounds = array<i64: 128, 128>}]} {
    %c0 = arith.constant 0 : index
    %c0_0 = arith.constant 0 : index
    %0 = vector.load %arg1[%c0, %c0_0] : memref<128x32xbf16, #tpu.memory_space<vmem>>, vector<128x32xbf16>
    %c0_1 = arith.constant 0 : index
    %c0_2 = arith.constant 0 : index
    %1 = vector.load %arg2[%c0_1, %c0_2] : memref<32x128xbf16, #tpu.memory_space<vmem>>, vector<32x128xbf16>
    %cst = arith.constant dense<0.000000e+00> : vector<128x128xf32>
    %2 = tpu.matmul %0, %1, %cst {dimension_numbers = #tpu.dot_dimension_numbers<[1], [0], [0], [1], [0, 0, 1, 1], [], []>} : vector<128x32xbf16>, vector<32x128xbf16>, vector<128x128xf32> -> vector<128x128xf32>
    %c0_3 = arith.constant 0 : index
    %c0_4 = arith.constant 0 : index
    %3 = vector.load %arg3[%c0_3, %c0_4] : memref<1x128xf32, #tpu.memory_space<vmem>>, vector<1x128xf32>
    %4 = vector.broadcast %3 : vector<1x128xf32> to vector<128x128xf32>
    %5 = arith.addf %2, %4 : vector<128x128xf32>
    %cst_5 = arith.constant 0.000000e+00 : f32
    %6 = vector.broadcast %cst_5 : f32 to vector<128x128xf32>
    %7 = arith.maximumf %5, %6 : vector<128x128xf32>
    %8 = arith.truncf %7 : vector<128x128xf32> to vector<128x128xbf16>
    %c0_6 = arith.constant 0 : index
    %c0_7 = arith.constant 0 : index
    %c0_8 = arith.constant 0 : index
    %c0_9 = arith.constant 0 : index
    %9 = vector.load %arg4[%c0_6, %c0_7, %c0_8, %c0_9] : memref<2x2x128x128xbf16, #tpu.memory_space<vmem>>, vector<1x1x128x128xbf16>
    %10 = vector.shape_cast %9 : vector<1x1x128x128xbf16> to vector<128x128xbf16>
    %cst_10 = arith.constant dense<0.000000e+00> : vector<128x128xf32>
    %11 = tpu.matmul %8, %10, %cst_10 {dimension_numbers = #tpu.dot_dimension_numbers<[1], [0], [0], [1], [0, 0, 1, 1], [], []>} : vector<128x128xbf16>, vector<128x128xbf16>, vector<128x128xf32> -> vector<128x128xf32>
    %c0_11 = arith.constant 0 : index
    %c0_12 = arith.constant 0 : index
    %c0_13 = arith.constant 0 : index
    %c0_14 = arith.constant 0 : index
    %12 = vector.load %arg5[%c0_11, %c0_12, %c0_13, %c0_14] : memref<2x2x1x128xf32, #tpu.memory_space<vmem>>, vector<1x1x1x128xf32>
    %13 = vector.shape_cast %12 : vector<1x1x1x128xf32> to vector<1x128xf32>
    %14 = vector.broadcast %13 : vector<1x128xf32> to vector<128x128xf32>
    %15 = arith.addf %11, %14 : vector<128x128xf32>
    %cst_15 = arith.constant 0.000000e+00 : f32
    %16 = vector.broadcast %cst_15 : f32 to vector<128x128xf32>
    %17 = arith.maximumf %15, %16 : vector<128x128xf32>
    %18 = arith.truncf %17 : vector<128x128xf32> to vector<128x128xbf16>
    %c0_16 = arith.constant 0 : index
    %c1 = arith.constant 1 : index
    %c0_17 = arith.constant 0 : index
    %c0_18 = arith.constant 0 : index
    %19 = vector.load %arg4[%c0_16, %c1, %c0_17, %c0_18] : memref<2x2x128x128xbf16, #tpu.memory_space<vmem>>, vector<1x1x128x128xbf16>
    %20 = vector.shape_cast %19 : vector<1x1x128x128xbf16> to vector<128x128xbf16>
    %cst_19 = arith.constant dense<0.000000e+00> : vector<128x128xf32>
    %21 = tpu.matmul %18, %20, %cst_19 {dimension_numbers = #tpu.dot_dimension_numbers<[1], [0], [0], [1], [0, 0, 1, 1], [], []>} : vector<128x128xbf16>, vector<128x128xbf16>, vector<128x128xf32> -> vector<128x128xf32>
    %c0_20 = arith.constant 0 : index
    %c1_21 = arith.constant 1 : index
    %c0_22 = arith.constant 0 : index
    %c0_23 = arith.constant 0 : index
    %22 = vector.load %arg5[%c0_20, %c1_21, %c0_22, %c0_23] : memref<2x2x1x128xf32, #tpu.memory_space<vmem>>, vector<1x1x1x128xf32>
    %23 = vector.shape_cast %22 : vector<1x1x1x128xf32> to vector<1x128xf32>
    %24 = vector.broadcast %23 : vector<1x128xf32> to vector<128x128xf32>
    %25 = arith.addf %21, %24 : vector<128x128xf32>
    %cst_24 = arith.constant 0.000000e+00 : f32
    %26 = vector.broadcast %cst_24 : f32 to vector<128x128xf32>
    %27 = arith.maximumf %25, %26 : vector<128x128xf32>
    %28 = arith.addf %7, %27 : vector<128x128xf32>
    %29 = arith.truncf %28 : vector<128x128xf32> to vector<128x128xbf16>
    %c1_25 = arith.constant 1 : index
    %c0_26 = arith.constant 0 : index
    %c0_27 = arith.constant 0 : index
    %c0_28 = arith.constant 0 : index
    %30 = vector.load %arg4[%c1_25, %c0_26, %c0_27, %c0_28] : memref<2x2x128x128xbf16, #tpu.memory_space<vmem>>, vector<1x1x128x128xbf16>
    %31 = vector.shape_cast %30 : vector<1x1x128x128xbf16> to vector<128x128xbf16>
    %cst_29 = arith.constant dense<0.000000e+00> : vector<128x128xf32>
    %32 = tpu.matmul %29, %31, %cst_29 {dimension_numbers = #tpu.dot_dimension_numbers<[1], [0], [0], [1], [0, 0, 1, 1], [], []>} : vector<128x128xbf16>, vector<128x128xbf16>, vector<128x128xf32> -> vector<128x128xf32>
    %c1_30 = arith.constant 1 : index
    %c0_31 = arith.constant 0 : index
    %c0_32 = arith.constant 0 : index
    %c0_33 = arith.constant 0 : index
    %33 = vector.load %arg5[%c1_30, %c0_31, %c0_32, %c0_33] : memref<2x2x1x128xf32, #tpu.memory_space<vmem>>, vector<1x1x1x128xf32>
    %34 = vector.shape_cast %33 : vector<1x1x1x128xf32> to vector<1x128xf32>
    %35 = vector.broadcast %34 : vector<1x128xf32> to vector<128x128xf32>
    %36 = arith.addf %32, %35 : vector<128x128xf32>
    %cst_34 = arith.constant 0.000000e+00 : f32
    %37 = vector.broadcast %cst_34 : f32 to vector<128x128xf32>
    %38 = arith.maximumf %36, %37 : vector<128x128xf32>
    %39 = arith.truncf %38 : vector<128x128xf32> to vector<128x128xbf16>
    %c1_35 = arith.constant 1 : index
    %c1_36 = arith.constant 1 : index
    %c0_37 = arith.constant 0 : index
    %c0_38 = arith.constant 0 : index
    %40 = vector.load %arg4[%c1_35, %c1_36, %c0_37, %c0_38] : memref<2x2x128x128xbf16, #tpu.memory_space<vmem>>, vector<1x1x128x128xbf16>
    %41 = vector.shape_cast %40 : vector<1x1x128x128xbf16> to vector<128x128xbf16>
    %cst_39 = arith.constant dense<0.000000e+00> : vector<128x128xf32>
    %42 = tpu.matmul %39, %41, %cst_39 {dimension_numbers = #tpu.dot_dimension_numbers<[1], [0], [0], [1], [0, 0, 1, 1], [], []>} : vector<128x128xbf16>, vector<128x128xbf16>, vector<128x128xf32> -> vector<128x128xf32>
    %c1_40 = arith.constant 1 : index
    %c1_41 = arith.constant 1 : index
    %c0_42 = arith.constant 0 : index
    %c0_43 = arith.constant 0 : index
    %43 = vector.load %arg5[%c1_40, %c1_41, %c0_42, %c0_43] : memref<2x2x1x128xf32, #tpu.memory_space<vmem>>, vector<1x1x1x128xf32>
    %44 = vector.shape_cast %43 : vector<1x1x1x128xf32> to vector<1x128xf32>
    %45 = vector.broadcast %44 : vector<1x128xf32> to vector<128x128xf32>
    %46 = arith.addf %42, %45 : vector<128x128xf32>
    %cst_44 = arith.constant 0.000000e+00 : f32
    %47 = vector.broadcast %cst_44 : f32 to vector<128x128xf32>
    %48 = arith.maximumf %46, %47 : vector<128x128xf32>
    %49 = arith.addf %28, %48 : vector<128x128xf32>
    %50 = arith.truncf %49 : vector<128x128xf32> to vector<128x128xbf16>
    %c0_45 = arith.constant 0 : index
    %c0_46 = arith.constant 0 : index
    %51 = vector.load %arg6[%c0_45, %c0_46] : memref<128x128xbf16, #tpu.memory_space<vmem>>, vector<128x128xbf16>
    %cst_47 = arith.constant dense<0.000000e+00> : vector<128x128xf32>
    %52 = tpu.matmul %50, %51, %cst_47 {dimension_numbers = #tpu.dot_dimension_numbers<[1], [0], [0], [1], [0, 0, 1, 1], [], []>} : vector<128x128xbf16>, vector<128x128xbf16>, vector<128x128xf32> -> vector<128x128xf32>
    %c0_48 = arith.constant 0 : index
    %c0_49 = arith.constant 0 : index
    %53 = vector.load %arg7[%c0_48, %c0_49] : memref<1x128xf32, #tpu.memory_space<vmem>>, vector<1x128xf32>
    %54 = vector.broadcast %53 : vector<1x128xf32> to vector<128x128xf32>
    %55 = arith.addf %52, %54 : vector<128x128xf32>
    %c0_50 = arith.constant 0 : index
    %c0_51 = arith.constant 0 : index
    %56 = vector.load %arg8[%c0_50, %c0_51] : memref<128x128xf32, #tpu.memory_space<vmem>>, vector<128x128xf32>
    tpu.vector_store %arg8[%c0_50, %c0_51], %55 {strides = array<i32>} : memref<128x128xf32, #tpu.memory_space<vmem>>, vector<128x128xf32>,
    return
  }
  func.func @transform_0(%arg0: i32) -> (i32, i32) {
    %c0_i32 = arith.constant 0 : i32
    %c0_i32_0 = arith.constant 0 : i32
    return %arg0, %c0_i32 : i32, i32
  }
  func.func @transform_1(%arg0: i32) -> (i32, i32) {
    %c0_i32 = arith.constant 0 : i32
    %c0_i32_0 = arith.constant 0 : i32
    %c0_i32_1 = arith.constant 0 : i32
    return %c0_i32, %c0_i32_0 : i32, i32
  }
  func.func @transform_2(%arg0: i32) -> (i32, i32) {
    %c0_i32 = arith.constant 0 : i32
    %c0_i32_0 = arith.constant 0 : i32
    %c0_i32_1 = arith.constant 0 : i32
    return %c0_i32, %c0_i32_0 : i32, i32
  }
  func.func @transform_3(%arg0: i32) -> (i32, i32, i32, i32) {
    %c0_i32 = arith.constant 0 : i32
    %c0_i32_0 = arith.constant 0 : i32
    %c0_i32_1 = arith.constant 0 : i32
    %c0_i32_2 = arith.constant 0 : i32
    %c0_i32_3 = arith.constant 0 : i32
    return %c0_i32, %c0_i32_0, %c0_i32_1, %c0_i32_2 : i32, i32, i32, i32
  }
  func.func @transform_4(%arg0: i32) -> (i32, i32, i32, i32) {
    %c0_i32 = arith.constant 0 : i32
    %c0_i32_0 = arith.constant 0 : i32
    %c0_i32_1 = arith.constant 0 : i32
    %c0_i32_2 = arith.constant 0 : i32
    %c0_i32_3 = arith.constant 0 : i32
    return %c0_i32, %c0_i32_0, %c0_i32_1, %c0_i32_2 : i32, i32, i32, i32
  }
  func.func @transform_5(%arg0: i32) -> (i32, i32) {
    %c0_i32 = arith.constant 0 : i32
    %c0_i32_0 = arith.constant 0 : i32
    %c0_i32_1 = arith.constant 0 : i32
    return %c0_i32, %c0_i32_0 : i32, i32
  }
  func.func @transform_6(%arg0: i32) -> (i32, i32) {
    %c0_i32 = arith.constant 0 : i32
    %c0_i32_0 = arith.constant 0 : i32
    %c0_i32_1 = arith.constant 0 : i32
    return %c0_i32, %c0_i32_0 : i32, i32
  }
  func.func @transform_7(%arg0: i32) -> (i32, i32) {
    %c0_i32 = arith.constant 0 : i32
    %c0_i32_0 = arith.constant 0 : i32
    return %arg0, %c0_i32 : i32, i32
  }
}

module attributes {stable_mosaic.version = 11 : i64} {
  func.func @_linear_model_kernel(%arg0: i32, %arg1: memref<128x32xbf16, #tpu.memory_space<vmem>>, %arg2: memref<32x128xbf16, #tpu.memory_space<vmem>>, %arg3: memref<1x128xf32, #tpu.memory_space<vmem>>, %arg4: memref<2x2x128x128xbf16, #tpu.memory_space<vmem>>, %arg5: memref<2x2x1x128xf32, #tpu.memory_space<vmem>>, %arg6: memref<128x128xbf16, #tpu.memory_space<vmem>>, %arg7: memref<1x128xf32, #tpu.memory_space<vmem>>, %arg8: memref<128x128xf32, #tpu.memory_space<vmem>>) attributes {dimension_semantics = [#tpu.dimension_semantics<parallel>], iteration_bounds = array<i64: 2>, scalar_prefetch = 0 : i64, scratch_operands = 0 : i64, tpu.core_type = #tpu.core_type<tc>, window_params = [{transform_indices = @transform_0, window_bounds = array<i64: 128, 32>}, {pipeline_mode = #tpu.pipeline_mode<synchronous>, transform_indices = @transform_1, window_bounds = array<i64: 32, 128>}, {pipeline_mode = #tpu.pipeline_mode<synchronous>, transform_indices = @transform_2, window_bounds = array<i64: 1, 128>}, {pipeline_mode = #tpu.pipeline_mode<synchronous>, transform_indices = @transform_3, window_bounds = array<i64: 2, 2, 128, 128>}, {pipeline_mode = #tpu.pipeline_mode<synchronous>, transform_indices = @transform_4, window_bounds = array<i64: 2, 2, 1, 128>}, {pipeline_mode = #tpu.pipeline_mode<synchronous>, transform_indices = @transform_5, window_bounds = array<i64: 128, 128>}, {pipeline_mode = #tpu.pipeline_mode<synchronous>, transform_indices = @transform_6, window_bounds = array<i64: 1, 128>}, {transform_indices = @transform_7, window_bounds = array<i64: 128, 128>}]} {
    %c0 = arith.constant 0 : index
    %c0_0 = arith.constant 0 : index
    %0 = vector.load %arg1[%c0, %c0_0] : memref<128x32xbf16, #tpu.memory_space<vmem>>, vector<128x32xbf16>
    %c0_1 = arith.constant 0 : index
    %c0_2 = arith.constant 0 : index
    %1 = vector.load %arg2[%c0_1, %c0_2] : memref<32x128xbf16, #tpu.memory_space<vmem>>, vector<32x128xbf16>
    %cst = arith.constant dense<0.000000e+00> : vector<128x128xf32>
    %2 = tpu.matmul %0, %1, %cst {dimension_numbers = #tpu.dot_dimension_numbers<[1], [0], [0], [1], [0, 0, 1, 1], [], []>} : vector<128x32xbf16>, vector<32x128xbf16>, vector<128x128xf32> -> vector<128x128xf32>
    %c0_3 = arith.constant 0 : index
    %c0_4 = arith.constant 0 : index
    %3 = vector.load %arg3[%c0_3, %c0_4] : memref<1x128xf32, #tpu.memory_space<vmem>>, vector<1x128xf32>
    %4 = vector.broadcast %3 : vector<1x128xf32> to vector<128x128xf32>
    %5 = arith.addf %2, %4 : vector<128x128xf32>
    %cst_5 = arith.constant 0.000000e+00 : f32
    %6 = vector.broadcast %cst_5 : f32 to vector<128x128xf32>
    %7 = arith.maximumf %5, %6 : vector<128x128xf32>
    %8 = arith.truncf %7 : vector<128x128xf32> to vector<128x128xbf16>
    %c0_6 = arith.constant 0 : index
    %c0_7 = arith.constant 0 : index
    %c0_8 = arith.constant 0 : index
    %c0_9 = arith.constant 0 : index
    %9 = vector.load %arg4[%c0_6, %c0_7, %c0_8, %c0_9] : memref<2x2x128x128xbf16, #tpu.memory_space<vmem>>, vector<1x1x128x128xbf16>
    %10 = vector.shape_cast %9 : vector<1x1x128x128xbf16> to vector<128x128xbf16>
    %cst_10 = arith.constant dense<0.000000e+00> : vector<128x128xf32>
    %11 = tpu.matmul %8, %10, %cst_10 {dimension_numbers = #tpu.dot_dimension_numbers<[1], [0], [0], [1], [0, 0, 1, 1], [], []>} : vector<128x128xbf16>, vector<128x128xbf16>, vector<128x128xf32> -> vector<128x128xf32>
    %c0_11 = arith.constant 0 : index
    %c0_12 = arith.constant 0 : index
    %c0_13 = arith.constant 0 : index
    %c0_14 = arith.constant 0 : index
    %12 = vector.load %arg5[%c0_11, %c0_12, %c0_13, %c0_14] : memref<2x2x1x128xf32, #tpu.memory_space<vmem>>, vector<1x1x1x128xf32>
    %13 = vector.shape_cast %12 : vector<1x1x1x128xf32> to vector<1x128xf32>
    %14 = vector.broadcast %13 : vector<1x128xf32> to vector<128x128xf32>
    %15 = arith.addf %11, %14 : vector<128x128xf32>
    %cst_15 = arith.constant 0.000000e+00 : f32
    %16 = vector.broadcast %cst_15 : f32 to vector<128x128xf32>
    %17 = arith.maximumf %15, %16 : vector<128x128xf32>
    %18 = arith.truncf %17 : vector<128x128xf32> to vector<128x128xbf16>
    %c0_16 = arith.constant 0 : index
    %c1 = arith.constant 1 : index
    %c0_17 = arith.constant 0 : index
    %c0_18 = arith.constant 0 : index
    %19 = vector.load %arg4[%c0_16, %c1, %c0_17, %c0_18] : memref<2x2x128x128xbf16, #tpu.memory_space<vmem>>, vector<1x1x128x128xbf16>
    %20 = vector.shape_cast %19 : vector<1x1x128x128xbf16> to vector<128x128xbf16>
    %cst_19 = arith.constant dense<0.000000e+00> : vector<128x128xf32>
    %21 = tpu.matmul %18, %20, %cst_19 {dimension_numbers = #tpu.dot_dimension_numbers<[1], [0], [0], [1], [0, 0, 1, 1], [], []>} : vector<128x128xbf16>, vector<128x128xbf16>, vector<128x128xf32> -> vector<128x128xf32>
    %c0_20 = arith.constant 0 : index
    %c1_21 = arith.constant 1 : index
    %c0_22 = arith.constant 0 : index
    %c0_23 = arith.constant 0 : index
    %22 = vector.load %arg5[%c0_20, %c1_21, %c0_22, %c0_23] : memref<2x2x1x128xf32, #tpu.memory_space<vmem>>, vector<1x1x1x128xf32>
    %23 = vector.shape_cast %22 : vector<1x1x1x128xf32> to vector<1x128xf32>
    %24 = vector.broadcast %23 : vector<1x128xf32> to vector<128x128xf32>
    %25 = arith.addf %21, %24 : vector<128x128xf32>
    %cst_24 = arith.constant 0.000000e+00 : f32
    %26 = vector.broadcast %cst_24 : f32 to vector<128x128xf32>
    %27 = arith.maximumf %25, %26 : vector<128x128xf32>
    %28 = arith.addf %7, %27 : vector<128x128xf32>
    %29 = arith.truncf %28 : vector<128x128xf32> to vector<128x128xbf16>
    %c1_25 = arith.constant 1 : index
    %c0_26 = arith.constant 0 : index
    %c0_27 = arith.constant 0 : index
    %c0_28 = arith.constant 0 : index
    %30 = vector.load %arg4[%c1_25, %c0_26, %c0_27, %c0_28] : memref<2x2x128x128xbf16, #tpu.memory_space<vmem>>, vector<1x1x128x128xbf16>
    %31 = vector.shape_cast %30 : vector<1x1x128x128xbf16> to vector<128x128xbf16>
    %cst_29 = arith.constant dense<0.000000e+00> : vector<128x128xf32>
    %32 = tpu.matmul %29, %31, %cst_29 {dimension_numbers = #tpu.dot_dimension_numbers<[1], [0], [0], [1], [0, 0, 1, 1], [], []>} : vector<128x128xbf16>, vector<128x128xbf16>, vector<128x128xf32> -> vector<128x128xf32>
    %c1_30 = arith.constant 1 : index
    %c0_31 = arith.constant 0 : index
    %c0_32 = arith.constant 0 : index
    %c0_33 = arith.constant 0 : index
    %33 = vector.load %arg5[%c1_30, %c0_31, %c0_32, %c0_33] : memref<2x2x1x128xf32, #tpu.memory_space<vmem>>, vector<1x1x1x128xf32>
    %34 = vector.shape_cast %33 : vector<1x1x1x128xf32> to vector<1x128xf32>
    %35 = vector.broadcast %34 : vector<1x128xf32> to vector<128x128xf32>
    %36 = arith.addf %32, %35 : vector<128x128xf32>
    %cst_34 = arith.constant 0.000000e+00 : f32
    %37 = vector.broadcast %cst_34 : f32 to vector<128x128xf32>
    %38 = arith.maximumf %36, %37 : vector<128x128xf32>
    %39 = arith.truncf %38 : vector<128x128xf32> to vector<128x128xbf16>
    %c1_35 = arith.constant 1 : index
    %c1_36 = arith.constant 1 : index
    %c0_37 = arith.constant 0 : index
    %c0_38 = arith.constant 0 : index
    %40 = vector.load %arg4[%c1_35, %c1_36, %c0_37, %c0_38] : memref<2x2x128x128xbf16, #tpu.memory_space<vmem>>, vector<1x1x128x128xbf16>
    %41 = vector.shape_cast %40 : vector<1x1x128x128xbf16> to vector<128x128xbf16>
    %cst_39 = arith.constant dense<0.000000e+00> : vector<128x128xf32>
    %42 = tpu.matmul %39, %41, %cst_39 {dimension_numbers = #tpu.dot_dimension_numbers<[1], [0], [0], [1], [0, 0, 1, 1], [], []>} : vector<128x128xbf16>, vector<128x128xbf16>, vector<128x128xf32> -> vector<128x128xf32>
    %c1_40 = arith.constant 1 : index
    %c1_41 = arith.constant 1 : index
    %c0_42 = arith.constant 0 : index
    %c0_43 = arith.constant 0 : index
    %43 = vector.load %arg5[%c1_40, %c1_41, %c0_42, %c0_43] : memref<2x2x1x128xf32, #tpu.memory_space<vmem>>, vector<1x1x1x128xf32>
    %44 = vector.shape_cast %43 : vector<1x1x1x128xf32> to vector<1x128xf32>
    %45 = vector.broadcast %44 : vector<1x128xf32> to vector<128x128xf32>
    %46 = arith.addf %42, %45 : vector<128x128xf32>
    %cst_44 = arith.constant 0.000000e+00 : f32
    %47 = vector.broadcast %cst_44 : f32 to vector<128x128xf32>
    %48 = arith.maximumf %46, %47 : vector<128x128xf32>
    %49 = arith.addf %28, %48 : vector<128x128xf32>
    %50 = arith.truncf %49 : vector<128x128xf32> to vector<128x128xbf16>
    %c0_45 = arith.constant 0 : index
    %c0_46 = arith.constant 0 : index
    %51 = vector.load %arg6[%c0_45, %c0_46] : memref<128x128xbf16, #tpu.memory_space<vmem>>, vector<128x128xbf16>
    %cst_47 = arith.constant dense<0.000000e+00> : vector<128x128xf32>
    %52 = tpu.matmul %50, %51, %cst_47 {dimension_numbers = #tpu.dot_dimension_numbers<[1], [0], [0], [1], [0, 0, 1, 1], [], []>} : vector<128x128xbf16>, vector<128x128xbf16>, vector<128x128xf32> -> vector<128x128xf32>
    %c0_48 = arith.constant 0 : index
    %c0_49 = arith.constant 0 : index
    %53 = vector.load %arg7[%c0_48, %c0_49] : memref<1x128xf32, #tpu.memory_space<vmem>>, vector<1x128xf32>
    %54 = vector.broadcast %53 : vector<1x128xf32> to vector<128x128xf32>
    %55 = arith.addf %52, %54 : vector<128x128xf32>
    %c0_50 = arith.constant 0 : index
    %c0_51 = arith.constant 0 : index
    %56 = vector.load %arg8[%c0_50, %c0_51] : memref<128x128xf32, #tpu.memory_space<vmem>>, vector<128x128xf32>
    tpu.vector_store %arg8[%c0_50, %c0_51], %55 {strides = array<i32>} : memref<128x128xf32, #tpu.memory_space<vmem>>, vector<128x128xf32>,
    return
  }
  func.func @transform_0(%arg0: i32) -> (i32, i32) {
    %c0_i32 = arith.constant 0 : i32
    %c0_i32_0 = arith.constant 0 : i32
    return %arg0, %c0_i32 : i32, i32
  }
  func.func @transform_1(%arg0: i32) -> (i32, i32) {
    %c0_i32 = arith.constant 0 : i32
    %c0_i32_0 = arith.constant 0 : i32
    %c0_i32_1 = arith.constant 0 : i32
    return %c0_i32, %c0_i32_0 : i32, i32
  }
  func.func @transform_2(%arg0: i32) -> (i32, i32) {
    %c0_i32 = arith.constant 0 : i32
    %c0_i32_0 = arith.constant 0 : i32
    %c0_i32_1 = arith.constant 0 : i32
    return %c0_i32, %c0_i32_0 : i32, i32
  }
  func.func @transform_3(%arg0: i32) -> (i32, i32, i32, i32) {
    %c0_i32 = arith.constant 0 : i32
    %c0_i32_0 = arith.constant 0 : i32
    %c0_i32_1 = arith.constant 0 : i32
    %c0_i32_2 = arith.constant 0 : i32
    %c0_i32_3 = arith.constant 0 : i32
    return %c0_i32, %c0_i32_0, %c0_i32_1, %c0_i32_2 : i32, i32, i32, i32
  }
  func.func @transform_4(%arg0: i32) -> (i32, i32, i32, i32) {
    %c0_i32 = arith.constant 0 : i32
    %c0_i32_0 = arith.constant 0 : i32
    %c0_i32_1 = arith.constant 0 : i32
    %c0_i32_2 = arith.constant 0 : i32
    %c0_i32_3 = arith.constant 0 : i32
    return %c0_i32, %c0_i32_0, %c0_i32_1, %c0_i32_2 : i32, i32, i32, i32
  }
  func.func @transform_5(%arg0: i32) -> (i32, i32) {
    %c0_i32 = arith.constant 0 : i32
    %c0_i32_0 = arith.constant 0 : i32
    %c0_i32_1 = arith.constant 0 : i32
    return %c0_i32, %c0_i32_0 : i32, i32
  }
  func.func @transform_6(%arg0: i32) -> (i32, i32) {
    %c0_i32 = arith.constant 0 : i32
    %c0_i32_0 = arith.constant 0 : i32
    %c0_i32_1 = arith.constant 0 : i32
    return %c0_i32, %c0_i32_0 : i32, i32
  }
  func.func @transform_7(%arg0: i32) -> (i32, i32) {
    %c0_i32 = arith.constant 0 : i32
    %c0_i32_0 = arith.constant 0 : i32
    return %arg0, %c0_i32 : i32, i32
  }
}

</mosaic_0001>

<bundles_post_ra>
// kernel: tpu_custom_call.1
= control target key start
LH: loop header
LB: loop body
LE: loop exit
PB: predicated region body
PF: predicated region fallthrough
CT: control target
= control target key end

     0   :  { %12 = vsyncpa [#allocation3], 0  ;;  %s2629_s0 = inlined_call_operand.vmem [shape: bf16[256,32], index: 0, kind: input, shape index: {}]   ;;  %s2630_s1 = inlined_call_operand.vmem [shape: bf16[32,128], index: 1, kind: input, shape index: {}]   ;;  %s2631_s2 = inlined_call_operand.vmem [shape: f32[1,128], index: 2, kind: input, shape index: {}]   ;;  %s2632_s3 = inlined_call_operand.hbm [shape: bf16[2,2,128,128], index: 3, kind: input, shape index: {}]   ;;  %s2633_s4 = inlined_call_operand.vmem [shape: f32[2,2,1,128], index: 4, kind: input, shape index: {}]   ;;  %s2634_s5 = inlined_call_operand.vmem [shape: bf16[128,128], index: 5, kind: input, shape index: {}]   ;;  %s2635_s6 = inlined_call_operand.vmem [shape: f32[1,128], index: 6, kind: input, shape index: {}]   ;;  %s2636_s7 = inlined_call_operand.hbm [shape: f32[256,128], index: 7, kind: output, shape index: {}]  }
   0x1   :  { %13 = vsyncpa [#allocation4], 0 }
   0x2   :  { %15 = vsyncpa [#allocation4 + $0x1], 0  ;;  %s2209_s24 = smov 0   ;;  %s2211_s25 = smov 0  }
   0x3   :  { %s2213_s26 = smov 0   ;;  %s2215_s27 = smov 0  }
   0x4 LB: > { %s2230_s28 = sadd.s32 4294967295, %s2161_s27   ;;  %s1599_s29 = sadd.s32 4294967294, %s2161_s27   ;;  %s2161_s27 = sphi %s2215_s27, %s2644_s27   ;;  %s2157_s26 = sphi %s2213_s26, %s2643_s26   ;;  %s2153_s25 = sphi %s2211_s25, %s2642_s25   ;;  %s2149_s24 = sphi %s2209_s24, %s2641_s24  }
   0x5   : > { %s2234_s30 = sadd.s32 1, %s2161_s27   ;;  %s180_s8 = sadd.s32 1, %s2157_s26 }
   0x6   : > { %s177_s9 = ssub.s32 %s2161_s27, %s2234_s30  ;;  %p190_p0 = scmp.ne.s32.totalorder %s2157_s26, %s2153_s25 }
   0x7   : > { %p178_p1 = scmp.eq.s32.totalorder %s177_s9, 0  ;;  %p191_p2 = scmp.eq.s32.totalorder %s2230_s28, 1 }
   0x8   : > { %p196_p3 = scmp.ne.s32.totalorder %s2153_s25, %s2149_s24  ;;  %p197_p4 = scmp.eq.s32.totalorder %s1599_s29, 1 }
   0x9   : > { %s2245_s10 = scalar_select %p178_p1, %s2157_s26, %s180_s8  }
   0xa   : > { %p2247_p5 = por %p191_p2, %p190_p0  ;;  %p2251_p6 = por %p197_p4, %p196_p3 }
   0xb   : > { %p1600_p7 = scmp.ge.s32.totalorder %s2161_s27, 1  ;;  %p204_p8 = scmp.lt.s32.totalorder %s2161_s27, 3 }
   0xc   : > { %s2638_s12 = scalar_select %p2251_p6, 1, 0 }
   0xd   : > { %p1981_p9 = scmp.eq.s32.totalorder %s2230_s28, 0  ;;  %p2258_p10 = pnand %p1600_p7, %p204_p8 }
   0xe   : > { %s2163_s14 = smov [#allocation2]  }
   0xf   : > { %s222_s15 = sshll.u32 %s2163_s14, 4  ;;  %p1973_p11 = pneg %p2258_p10  ;;  %s223_s15 = int_to_ptr.vmem [resolvable:$true] %s222_s15 }
  0x10   : > { %s2082_s16 = scalar_lea.vmem %s223_s15, 4096  ;;  %p2090_p3 = scmp.lt.s32.totalorder %s223_s15, %s223_s15 }
  0x11   : > { %p1974_p12 = pnand %p1981_p9, %p1973_p11  ;;  %p2083_p0 = scmp.ne.s32.totalorder %s223_s15, %s2082_s16 }
  0x12   : > { %p2091_p4 = scmp.lt.s32.totalorder %s2082_s16, %s2082_s16 }
  0x13   : > { %p2073_p13 = pneg %p1974_p12 }
  0x14   : > { %p2092_p6 = por %p2091_p4, %p2090_p3 }
  0x15   : > { %p2085_p1 = pnand %p2083_p0, %p2073_p13 }
  0x17   : > { %p2086_p2 = pneg %p2085_p1 }
  0x19   : > { %p2093_p7 = pnand %p2092_p6, %p2086_p2 }
  0x1b   : > { %2096 = shalt.err (!%p2093_p7)
}
  0x1c   : > { %s2164_s17 = smov 64   ;;  %s2165_s18 = smov 4  }
  0x1d   : > { %1976 = dma.hbm_to_vmem [thread:$0]  (!%p1974_p12), %s2632_s3, 4096, %s223_s15, [#allocation3], %s2164_s17, %s2164_s17, %s2165_s18  }
  0x1e   : > { %256 = sbr.rel (%p2258_p10) target bundleno = 1318 (0x526), region = 48 }
  0x23   : > { %2140 = dma.done.wait (%p1981_p9), [#allocation3], 4096  }
  0x24   : > { %2142 = vsyncadd (%p1981_p9), [#allocation3], 4294963200  ;;  %s1606_s21 = sshll.u32 %s2230_s28, 4  ;;  %v2021_v0 = vld [vmem:[%s2630_s1 + $0x8] sm:$0xff]   ;;  %v2022_v1 = vld [vmem:[%s2630_s1] sm:$0xff]   ;;  %vm375_vm0 = vcmask 261120  }
  0x25   : > { %p289_p8 = scmp.lt.s32.totalorder %s1606_s21, 31  ;;  %1771 = vmatprep.subr.bf16.mxu0 %v2021_v0  ;;  %v2031_v5 = vld [vmem:[#allocation2 + $0x38] sm:$0xff]   ;;  %v2032_v6 = vld [vmem:[#allocation2 + $0x30] sm:$0xff]   ;;  %v2033_v9 = vld [vmem:[#allocation2 + $0x28] sm:$0xff]   ;;  %s285_s13 = sand.u32 1, %s2153_s25  }
  0x26   : > { %1772 = vmatpush3.bf16.msra.mxu0 %v2021_v0  ;;  %1791 = vmatprep.subr.bf16.mxu1 %v2031_v5  ;;  %v2034_v10 = vld [vmem:[#allocation2 + $0x20] sm:$0xff]   ;;  %v2035_v12 = vld [vmem:[#allocation2 + $0x18] sm:$0xff]   ;;  %v2036_v15 = vld [vmem:[#allocation2 + $0x10] sm:$0xff]   ;;  %s1605_s15 = sshll.u32 %s285_s13, 7  ;;  %s1680_s19 = sshll.u32 %s2230_s28, 11 }
  0x27   : > { %s2646_s21 = smov (!%p289_p8, %s1606_s21), 31  ;;  %1773 = vmatprep.subr.bf16.mxu0 %v2022_v1  ;;  %1792 = vmatpush3.bf16.msra.mxu1 %v2031_v5  ;;  %v2037_v16 = vld [vmem:[#allocation2 + $0x8] sm:$0xff]   ;;  %v2038_v17 = vld [vmem:[#allocation2] sm:$0xff]   ;;  %v2039_v18 = vld [vmem:[#allocation2 + $0x78] sm:$0xff]   ;;  %s2560_s18 = scalar_lea.vmem [#allocation5], %s1605_s15 }
  0x28   : > { %s1607_s22 = sshll.u32 %s2646_s21, 2  ;;  %1793 = vmatprep.subr.bf16.mxu1 %v2032_v6  ;;  %v2040_v19 = vld [vmem:[#allocation2 + $0x70] sm:$0xff]   ;;  %v2041_v20 = vld [vmem:[#allocation2 + $0x68] sm:$0xff]   ;;  %v2042_v21 = vld [vmem:[#allocation2 + $0x60] sm:$0xff]   ;;  %s1525_s20 = sshll.u32 %s2560_s18, 4  ;;  %s2583_s20 = int_to_ptr.vmem [resolvable:$true] %s1525_s20 }
  0x29   : > { %s2279_s8 = scalar_lea.vmem %s2629_s0, %s1607_s22  ;;  %v2043_v22 = vld [vmem:[#allocation2 + $0x58] sm:$0xff]   ;;  %v1608_v25 = vld [vmem:[%s2631_s2] ss:$0 sm:$0xff]  ;;  %s2581_s23 = scalar_lea.hbm %s2636_s7, %s1680_s19 }
  0x2a   : > { %v2023_v2 = vld [vmem:[%s2279_s8] sm:$0xff]   ;;  %v2024_v3 = vld [vmem:[%s2279_s8 + $0x8] sm:$0xff]   ;;  %1774 = vmatpush3.bf16.msra.mxu0 %v2022_v1  ;;  %v2025_v4 = vld [vmem:[%s2279_s8 + $0x10] sm:$0xff]   ;;  %s2589_s28 = scalar_lea.sflag [#allocation4], %s285_s13  ;;  %s2097_s29 = scalar_lea.vmem %s2583_s20, 2048 }
  0x2b   : > { %1775 = vmatprep.mubr.msk.bf16.mxu0 %vm375_vm0, %v2023_v2  ;;  %v2026_v7 = vld [vmem:[%s2279_s8 + $0x18] sm:$0xff]   ;;  %v2027_v8 = vld [vmem:[%s2279_s8 + $0x20] sm:$0xff]   ;;  %1794 = vmatpush3.bf16.msra.mxu1 %v2032_v6  ;;  %v2028_v11 = vld [vmem:[%s2279_s8 + $0x28] sm:$0xff]   ;;  %p2098_p6 = scmp.ne.s32.totalorder %s2583_s20, %s2097_s29 }
  0x2c   : > { %1795 = vmatprep.subr.bf16.mxu1 %v2033_v9  ;;  %v2029_v13 = vld [vmem:[%s2279_s8 + $0x30] sm:$0xff]   ;;  %v2030_v14 = vld [vmem:[%s2279_s8 + $0x38] sm:$0xff]   ;;  %1823 = vmatprep.subr.bf16.mxu0 %v2039_v18  ;;  %s2166_s8 = smov [#allocation5]  }
  0x2d   : > { %1776 = vmatmul.mubr.msk.bf16.vlgmr.msra.gmra.mxu0 %vm375_vm0, %v2024_v3  ;;  %p2099_p9 = pnand %p2098_p6, %p2247_p5  ;;  %s2101_s9 = sshll.u32 %s2166_s8, 4  ;;  %s2102_s9 = int_to_ptr.vmem [resolvable:$false] %s2101_s9 }
  0x2e   : > { %1779 = vmatprep.mubr.msk.bf16.mxu0 %vm375_vm0, %v2025_v4  ;;  %1824 = vmatpush3.bf16.msra.mxu0 %v2039_v18  ;;  %v2046_v18 = vld [vmem:[#allocation2 + $0x40] sm:$0xff]   ;;  %s2103_s14 = scalar_lea.vmem %s2102_s9, 4096  ;;  %p2104_p11 = scmp.lt.s32.totalorder %s2583_s20, %s2102_s9 }
  0x2f   : > { %1796 = vmatpush3.bf16.msra.mxu1 %v2033_v9  ;;  %1825 = vmatprep.subr.bf16.mxu0 %v2040_v19  ;;  %p2100_p10 = pneg %p2099_p9  ;;  %p2105_p12 = scmp.lt.s32.totalorder %s2103_s14, %s2097_s29 }
  0x30   : > { %1797 = vmatprep.subr.bf16.mxu1 %v2034_v10 }
  0x31   : > { %p2106_p13 = por %p2105_p12, %p2104_p11 }
  0x32   : > { %1826 = vmatpush3.bf16.msra.mxu0 %v2040_v19  ;;  %v2047_v19 = vld [vmem:[#allocation2 + $0xb8] sm:$0xff]  }
  0x33   : > { %1798 = vmatpush3.bf16.msra.mxu1 %v2034_v10  ;;  %1827 = vmatprep.subr.bf16.mxu0 %v2041_v20  ;;  %p2107_p0 = pnand %p2106_p13, %p2100_p10 }
  0x34   : > { %1799 = vmatprep.subr.bf16.mxu1 %v2035_v12 }
  0x35   : > { %1780 = vmatmul.mubr.msk.bf16.gmra.mxu0 %vm375_vm0, %v2026_v7 }
  0x36   : > { %1783 = vmatprep.mubr.msk.bf16.mxu0 %vm375_vm0, %v2027_v8  ;;  %1828 = vmatpush3.bf16.msra.mxu0 %v2041_v20  ;;  %v2048_v20 = vld [vmem:[#allocation2 + $0xb0] sm:$0xff]  }
  0x37   : > { %1800 = vmatpush3.bf16.msra.mxu1 %v2035_v12  ;;  %1829 = vmatprep.subr.bf16.mxu0 %v2042_v21 }
  0x38   : > { %1801 = vmatprep.subr.bf16.mxu1 %v2036_v15 }
  0x3a   : > { %1830 = vmatpush3.bf16.msra.mxu0 %v2042_v21  ;;  %v2049_v21 = vld [vmem:[#allocation2 + $0xa8] sm:$0xff]  }
  0x3b   : > { %1802 = vmatpush3.bf16.msra.mxu1 %v2036_v15  ;;  %1831 = vmatprep.subr.bf16.mxu0 %v2043_v22 }
  0x3c   : > { %1803 = vmatprep.subr.bf16.mxu1 %v2037_v16 }
  0x3d   : > { %1784 = vmatmul.mubr.msk.bf16.gmra.mxu0 %vm375_vm0, %v2028_v11 }
  0x3e   : > { %1787 = vmatprep.mubr.msk.bf16.mxu0 %vm375_vm0, %v2029_v13  ;;  %1832 = vmatpush3.bf16.msra.mxu0 %v2043_v22  ;;  %v2050_v22 = vld [vmem:[#allocation2 + $0xa0] sm:$0xff]  }
  0x3f   : > { %1804 = vmatpush3.bf16.msra.mxu1 %v2037_v16  ;;  %v2044_v16 = vld [vmem:[#allocation2 + $0x50] sm:$0xff]  }
  0x40   : > { %1805 = vmatprep.subr.bf16.mxu1 %v2038_v17  ;;  %1833 = vmatprep.subr.bf16.mxu0 %v2044_v16 }
  0x42   : > { %1834 = vmatpush3.bf16.msra.mxu0 %v2044_v16 }
  0x43   : > { %1806 = vmatpush3.bf16.msra.mxu1 %v2038_v17  ;;  %v2045_v17 = vld [vmem:[#allocation2 + $0x48] sm:$0xff]  }
  0x44   : > { %1835 = vmatprep.subr.bf16.mxu0 %v2045_v17  ;;  %1855 = vmatprep.subr.bf16.mxu1 %v2047_v19 }
  0x45   : > { %1788 = vmatmul.mubr.msk.bf16.gmra.mxu0 %vm375_vm0, %v2030_v14 }
  0x46   : > { %1836 = vmatpush3.bf16.msra.mxu0 %v2045_v17 }
  0x47   : > { %1837 = vmatprep.subr.bf16.mxu0 %v2046_v18 }
  0x4a   : > { %1838 = vmatpush3.bf16.msra.mxu0 %v2046_v18 }
  0xed   : > { %v1777_v23 = vpop.f32.mrf.mxu0 }
  0xee   : > { %v2310_v29 = vadd.f32 %v1777_v23, %v1608_v25  ;;  %v2051_v23 = vld [vmem:[#allocation2 + $0x98] sm:$0xff]  }
  0xef   : > { %v434_v24 = vpop.f32.mrf.mxu0 }
  0xf0   : > { %v2306_v27 = vadd.f32 %v1608_v25, %v434_v24  ;;  %v499_v36 = vmax.f32 %v2310_v29, 0.0 }
  0xf1   : > { %v1778_v26 = vpop.f32.mrf.mxu0 }
  0xf2   : > { %v2308_v28 = vadd.f32 %v1778_v26, %v1608_v25  ;;  %v497_v34 = vmax.f32 %v2306_v27, 0.0  ;;  %v1627_v26 = vld [vmem:[%s2633_s4] ss:$0 sm:$0xff] }
  0xf3   : > { %v437_v30 = vpop.f32.mrf.mxu0 }
  0xf4   : > { %v2312_v31 = vadd.f32 %v1608_v25, %v437_v30  ;;  %v500_v32 = vmax.f32 %v2308_v28, 0.0 }
  0xf5   : > { %v1781_v33 = vpop.f32.mrf.mxu0 }
  0xf6   : > { %v498_v35 = vmax.f32 %v2312_v31, 0.0  ;;  %v514_v39 = vpack.c.bf16 %v500_v32, %v499_v36  ;;  %v2330_v43 = vadd.f32 %v1781_v33, %v1608_v25 }
  0xf7   : > { %v450_v37 = vpop.f32.mrf.mxu0 }
  0xf8   : > { %v513_v38 = vpack.c.bf16 %v498_v35, %v497_v34  ;;  %v2326_v41 = vadd.f32 %v1608_v25, %v450_v37  ;;  %v503_v50 = vmax.f32 %v2330_v43, 0.0 }
  0xf9   : > { %v1782_v40 = vpop.f32.mrf.mxu0 }
  0xfa   : > { %v2328_v42 = vadd.f32 %v1782_v40, %v1608_v25  ;;  %1807 = vmatprep.mubr.bf16.mxu1 %v513_v38  ;;  %v501_v48 = vmax.f32 %v2326_v41, 0.0 }
  0xfb   : > { %v453_v44 = vpop.f32.mrf.mxu0  ;;  %1808 = vmatmul.mubr.bf16.vlgmr.msra.gmra.mxu1 %v514_v39 }
  0xfc   : > { %v2332_v45 = vadd.f32 %v1608_v25, %v453_v44  ;;  %v504_v46 = vmax.f32 %v2328_v42, 0.0  ;;  %1856 = vmatpush3.bf16.msra.mxu1 %v2047_v19 }
  0xfd   : > { %v1785_v47 = vpop.f32.mrf.mxu0  ;;  %1857 = vmatprep.subr.bf16.mxu1 %v2048_v20 }
  0xfe   : > { %v502_v49 = vmax.f32 %v2332_v45, 0.0  ;;  %v516_v53 = vpack.c.bf16 %v504_v46, %v503_v50  ;;  %v2350_v57 = vadd.f32 %v1785_v47, %v1608_v25 }
  0xff   : > { %v466_v51 = vpop.f32.mrf.mxu0 }
 0x100   : > { %v515_v52 = vpack.c.bf16 %v502_v49, %v501_v48  ;;  %v2346_v55 = vadd.f32 %v1608_v25, %v466_v51  ;;  %v507_v0 = vmax.f32 %v2350_v57, 0.0  ;;  %1858 = vmatpush3.bf16.msra.mxu1 %v2048_v20 }
 0x101   : > { %v1786_v54 = vpop.f32.mrf.mxu0  ;;  %1859 = vmatprep.subr.bf16.mxu1 %v2049_v21 }
 0x102   : > { %v2348_v56 = vadd.f32 %v1786_v54, %v1608_v25  ;;  %1811 = vmatprep.mubr.bf16.mxu1 %v515_v52  ;;  %v505_v62 = vmax.f32 %v2346_v55, 0.0 }
 0x103   : > { %v469_v58 = vpop.f32.mrf.mxu0  ;;  %1812 = vmatmul.mubr.bf16.gmra.mxu1 %v516_v53 }
 0x104   : > { %v2352_v59 = vadd.f32 %v1608_v25, %v469_v58  ;;  %v508_v60 = vmax.f32 %v2348_v56, 0.0  ;;  %1860 = vmatpush3.bf16.msra.mxu1 %v2049_v21 }
 0x105   : > { %v1789_v61 = vpop.f32.mrf.mxu0  ;;  %1861 = vmatprep.subr.bf16.mxu1 %v2050_v22 }
 0x106   : > { %v506_v63 = vmax.f32 %v2352_v59, 0.0  ;;  %v518_v3 = vpack.c.bf16 %v508_v60, %v507_v0  ;;  %v2370_v7 = vadd.f32 %v1789_v61, %v1608_v25 }
 0x107   : > { %v482_v1 = vpop.f32.mrf.mxu0 }
 0x108   : > { %v517_v2 = vpack.c.bf16 %v506_v63, %v505_v62  ;;  %v2366_v5 = vadd.f32 %v1608_v25, %v482_v1  ;;  %v511_v13 = vmax.f32 %v2370_v7, 0.0  ;;  %1862 = vmatpush3.bf16.msra.mxu1 %v2050_v22  ;;  %v2063_v7 = vld [vmem:[%s2634_s5 + $0x38] sm:$0xff]  }
 0x109   : > { %v1790_v4 = vpop.f32.mrf.mxu0  ;;  %1863 = vmatprep.subr.bf16.mxu1 %v2051_v23 }
 0x10a   : > { %v2368_v6 = vadd.f32 %v1790_v4, %v1608_v25  ;;  %1815 = vmatprep.mubr.bf16.mxu1 %v517_v2  ;;  %v509_v11 = vmax.f32 %v2366_v5, 0.0  ;;  %v2061_v5 = vld [vmem:[#allocation2 + $0xc8] sm:$0xff]  }
 0x10b   : > { %v485_v8 = vpop.f32.mrf.mxu0  ;;  %1816 = vmatmul.mubr.bf16.gmra.mxu1 %v518_v3 }
 0x10c   : > { %v2372_v9 = vadd.f32 %v1608_v25, %v485_v8  ;;  %v512_v10 = vmax.f32 %v2368_v6, 0.0  ;;  %1864 = vmatpush3.bf16.msra.mxu1 %v2051_v23 }
 0x10e   : > { %v510_v12 = vmax.f32 %v2372_v9, 0.0  ;;  %v520_v15 = vpack.c.bf16 %v512_v10, %v511_v13  ;;  %v2062_v9 = vld [vmem:[#allocation2 + $0xc0] sm:$0xff]  }
 0x110   : > { %v519_v14 = vpack.c.bf16 %v510_v12, %v509_v11 }
 0x112   : > { %1819 = vmatprep.mubr.bf16.mxu1 %v519_v14 }
 0x113   : > { %1820 = vmatmul.mubr.bf16.gmra.mxu1 %v520_v15 }
 0x1bb   : > { %v1809_v24 = vpop.f32.mrf.mxu1 }
 0x1bc   : > { %v635_v38 = vadd.f32 %v1809_v24, %v1627_v26 }
 0x1bd   : > { %v626_v25 = vpop.f32.mrf.mxu1 }
 0x1be   : > { %v627_v33 = vadd.f32 %v1627_v26, %v626_v25  ;;  %v691_v53 = vmax.f32 %v635_v38, 0.0 }
 0x1bf   : > { %v1810_v30 = vpop.f32.mrf.mxu1 }
 0x1c0   : > { %v638_v37 = vadd.f32 %v1810_v30, %v1627_v26  ;;  %v689_v51 = vmax.f32 %v627_v33, 0.0 }
 0x1c1   : > { %v629_v39 = vpop.f32.mrf.mxu1 }
 0x1c2   : > { %v630_v40 = vadd.f32 %v1627_v26, %v629_v39  ;;  %v692_v44 = vmax.f32 %v638_v37, 0.0 }
 0x1c3   : > { %v1813_v47 = vpop.f32.mrf.mxu1 }
 0x1c4   : > { %v690_v52 = vmax.f32 %v630_v40, 0.0  ;;  %v706_v61 = vpack.c.bf16 %v692_v44, %v691_v53  ;;  %v651_v4 = vadd.f32 %v1813_v47, %v1627_v26 }
 0x1c5   : > { %v642_v54 = vpop.f32.mrf.mxu1 }
 0x1c6   : > { %v705_v58 = vpack.c.bf16 %v690_v52, %v689_v51  ;;  %v643_v2 = vadd.f32 %v1627_v26, %v642_v54  ;;  %v695_v19 = vmax.f32 %v651_v4, 0.0 }
 0x1c7   : > { %v1814_v1 = vpop.f32.mrf.mxu1 }
 0x1c8   : > { %v654_v3 = vadd.f32 %v1814_v1, %v1627_v26  ;;  %1839 = vmatprep.mubr.bf16.mxu0 %v705_v58  ;;  %v693_v17 = vmax.f32 %v643_v2, 0.0 }
 0x1c9   : > { %v645_v8 = vpop.f32.mrf.mxu1  ;;  %1840 = vmatmul.mubr.bf16.vlgmr.msra.gmra.mxu0 %v706_v61 }
 0x1ca   : > { %v646_v14 = vadd.f32 %v1627_v26, %v645_v8  ;;  %v696_v15 = vmax.f32 %v654_v3, 0.0 }
 0x1cb   : > { %v1817_v16 = vpop.f32.mrf.mxu1 }
 0x1cc   : > { %v694_v18 = vmax.f32 %v646_v14, 0.0  ;;  %v708_v22 = vpack.c.bf16 %v696_v15, %v695_v19  ;;  %v667_v30 = vadd.f32 %v1817_v16, %v1627_v26  ;;  %v2053_v19 = vld [vmem:[#allocation2 + $0x88] sm:$0xff]  }
 0x1cd   : > { %v658_v20 = vpop.f32.mrf.mxu1 }
 0x1ce   : > { %v707_v21 = vpack.c.bf16 %v694_v18, %v693_v17  ;;  %v659_v24 = vadd.f32 %v1627_v26, %v658_v20  ;;  %v699_v47 = vmax.f32 %v667_v30, 0.0  ;;  %v2052_v18 = vld [vmem:[#allocation2 + $0x90] sm:$0xff]   ;;  %v2054_v20 = vld [vmem:[#allocation2 + $0x80] sm:$0xff]  }
 0x1cf   : > { %v1818_v23 = vpop.f32.mrf.mxu1  ;;  %1865 = vmatprep.subr.bf16.mxu1 %v2052_v18  ;;  %v2392_v30 = vld [vmem:[%s2633_s4 + $0x1] ss:$0 sm:$0xff] }
 0x1d0   : > { %v670_v25 = vadd.f32 %v1818_v23, %v1627_v26  ;;  %1843 = vmatprep.mubr.bf16.mxu0 %v707_v21  ;;  %v697_v40 = vmax.f32 %v659_v24, 0.0  ;;  %1866 = vmatpush3.bf16.msra.mxu1 %v2052_v18  ;;  %v2055_v21 = vld [vmem:[#allocation2 + $0xf8] sm:$0xff]   ;;  %v2058_v23 = vld [vmem:[#allocation2 + $0xe0] sm:$0xff]  }
 0x1d1   : > { %v661_v33 = vpop.f32.mrf.mxu1  ;;  %1844 = vmatmul.mubr.bf16.gmra.mxu0 %v708_v22  ;;  %1867 = vmatprep.subr.bf16.mxu1 %v2053_v19  ;;  %v2056_v22 = vld [vmem:[#allocation2 + $0xf0] sm:$0xff]   ;;  %v2059_v24 = vld [vmem:[#allocation2 + $0xd8] sm:$0xff]  }
 0x1d2   : > { %v662_v37 = vadd.f32 %v1627_v26, %v661_v33  ;;  %v700_v38 = vmax.f32 %v670_v25, 0.0  ;;  %1887 = vmatprep.subr.bf16.mxu0 %v2055_v21 }
 0x1d3   : > { %v1821_v39 = vpop.f32.mrf.mxu1  ;;  %1888 = vmatpush3.bf16.msra.mxu0 %v2055_v21 }
 0x1d4   : > { %v698_v44 = vmax.f32 %v662_v37, 0.0  ;;  %v710_v53 = vpack.c.bf16 %v700_v38, %v699_v47  ;;  %v683_v1 = vadd.f32 %v1821_v39, %v1627_v26  ;;  %1868 = vmatpush3.bf16.msra.mxu1 %v2053_v19  ;;  %1889 = vmatprep.subr.bf16.mxu0 %v2056_v22 }
 0x1d5   : > { %v674_v51 = vpop.f32.mrf.mxu1  ;;  %1869 = vmatprep.subr.bf16.mxu1 %v2054_v20 }
 0x1d6   : > { %v709_v52 = vpack.c.bf16 %v698_v44, %v697_v40  ;;  %v675_v58 = vadd.f32 %v1627_v26, %v674_v51  ;;  %v703_v15 = vmax.f32 %v683_v1, 0.0 }
 0x1d7   : > { %v1822_v54 = vpop.f32.mrf.mxu1  ;;  %1890 = vmatpush3.bf16.msra.mxu0 %v2056_v22 }
 0x1d8   : > { %v686_v61 = vadd.f32 %v1822_v54, %v1627_v26  ;;  %1847 = vmatprep.mubr.bf16.mxu0 %v709_v52  ;;  %v701_v8 = vmax.f32 %v675_v58, 0.0  ;;  %1870 = vmatpush3.bf16.msra.mxu1 %v2054_v20 }
 0x1d9   : > { %v677_v2 = vpop.f32.mrf.mxu1  ;;  %1848 = vmatmul.mubr.bf16.gmra.mxu0 %v710_v53  ;;  %1951 = vmatprep.subr.bf16.mxu1 %v2063_v7 }
 0x1da   : > { %v678_v3 = vadd.f32 %v1627_v26, %v677_v2  ;;  %v704_v4 = vmax.f32 %v686_v61, 0.0  ;;  %v2057_v26 = vld [vmem:[#allocation2 + $0xe8] sm:$0xff]  }
 0x1db   : > { %1891 = vmatprep.subr.bf16.mxu0 %v2057_v26 }
 0x1dc   : > { %v702_v14 = vmax.f32 %v678_v3, 0.0  ;;  %v712_v17 = vpack.c.bf16 %v704_v4, %v703_v15  ;;  %1892 = vmatpush3.bf16.msra.mxu0 %v2057_v26 }
 0x1dd   : > { %1893 = vmatprep.subr.bf16.mxu0 %v2058_v23 }
 0x1de   : > { %v711_v16 = vpack.c.bf16 %v702_v14, %v701_v8 }
 0x1e0   : > { %1851 = vmatprep.mubr.bf16.mxu0 %v711_v16  ;;  %1894 = vmatpush3.bf16.msra.mxu0 %v2058_v23 }
 0x1e1   : > { %1852 = vmatmul.mubr.bf16.gmra.mxu0 %v712_v17  ;;  %1895 = vmatprep.subr.bf16.mxu0 %v2059_v24 }
 0x1e4   : > { %1896 = vmatpush3.bf16.msra.mxu0 %v2059_v24 }
 0x289   : > { %v1841_v25 = vpop.f32.mrf.mxu0 }
 0x28a   : > { %v829_v38 = vadd.f32 %v1841_v25, %v2392_v30 }
 0x28b   : > { %v820_v33 = vpop.f32.mrf.mxu0 }
 0x28c   : > { %v821_v37 = vadd.f32 %v2392_v30, %v820_v33  ;;  %v885_v53 = vmax.f32 %v829_v38, 0.0 }
 0x28d   : > { %v1842_v39 = vpop.f32.mrf.mxu0 }
 0x28e   : > { %v832_v40 = vadd.f32 %v1842_v39, %v2392_v30  ;;  %v883_v47 = vmax.f32 %v821_v37, 0.0  ;;  %v2413_v8 = vadd.f32 %v885_v53, %v499_v36 }
 0x28f   : > { %v823_v44 = vpop.f32.mrf.mxu0 }
 0x290   : > { %v886_v51 = vmax.f32 %v832_v40, 0.0  ;;  %v824_v52 = vadd.f32 %v2392_v30, %v823_v44  ;;  %v2404_v2 = vadd.f32 %v883_v47, %v497_v34 }
 0x291   : > { %v1845_v54 = vpop.f32.mrf.mxu0 }
 0x292   : > { %v884_v58 = vmax.f32 %v824_v52, 0.0  ;;  %v2400_v61 = vadd.f32 %v886_v51, %v500_v32  ;;  %v845_v14 = vadd.f32 %v1845_v54, %v2392_v30 }
 0x293   : > { %v836_v1 = vpop.f32.mrf.mxu0 }
 0x294   : > { %v2408_v3 = vadd.f32 %v884_v58, %v498_v35  ;;  %v837_v4 = vadd.f32 %v2392_v30, %v836_v1  ;;  %v916_v34 = vpack.c.bf16 %v2400_v61, %v2413_v8  ;;  %v889_v29 = vmax.f32 %v845_v14, 0.0 }
 0x295   : > { %v1846_v28 = vpop.f32.mrf.mxu0 }
 0x296   : > { %v848_v32 = vadd.f32 %v1846_v28, %v2392_v30  ;;  %v915_v27 = vpack.c.bf16 %v2408_v3, %v2404_v2  ;;  %v887_v35 = vmax.f32 %v837_v4, 0.0  ;;  %v2437_v26 = vadd.f32 %v889_v29, %v503_v50 }
 0x297   : > { %v839_v31 = vpop.f32.mrf.mxu0 }
 0x298   : > { %v890_v15 = vmax.f32 %v848_v32, 0.0  ;;  %v840_v16 = vadd.f32 %v2392_v30, %v839_v31  ;;  %1871 = vmatprep.mubr.bf16.mxu1 %v915_v27  ;;  %v2428_v20 = vadd.f32 %v887_v35, %v501_v48  ;;  %v1647_v32 = vld [vmem:[%s2633_s4 + $0x2] ss:$0 sm:$0xff] }
 0x299   : > { %v1849_v36 = vpop.f32.mrf.mxu0  ;;  %1872 = vmatmul.mubr.bf16.vlgmr.msra.gmra.mxu1 %v916_v34 }
 0x29a   : > { %v888_v17 = vmax.f32 %v840_v16, 0.0  ;;  %v2424_v18 = vadd.f32 %v890_v15, %v504_v46  ;;  %v861_v23 = vadd.f32 %v1849_v36, %v2392_v30  ;;  %1959 = vmatpush3.bf16.msra.mxu1 %v2063_v7 }
 0x29b   : > { %v852_v19 = vpop.f32.mrf.mxu0 }
 0x29c   : > { %v2432_v21 = vadd.f32 %v888_v17, %v502_v49  ;;  %v853_v22 = vadd.f32 %v2392_v30, %v852_v19  ;;  %v918_v45 = vpack.c.bf16 %v2424_v18, %v2437_v26  ;;  %v893_v43 = vmax.f32 %v861_v23, 0.0 }
 0x29d   : > { %v1850_v42 = vpop.f32.mrf.mxu0 }
 0x29e   : > { %v864_v46 = vadd.f32 %v1850_v42, %v2392_v30  ;;  %v917_v41 = vpack.c.bf16 %v2432_v21, %v2428_v20  ;;  %v891_v49 = vmax.f32 %v853_v22, 0.0  ;;  %v2461_v47 = vadd.f32 %v893_v43, %v507_v0 }
 0x29f   : > { %v855_v48 = vpop.f32.mrf.mxu0 }
 0x2a0   : > { %v894_v24 = vmax.f32 %v864_v46, 0.0  ;;  %v856_v25 = vadd.f32 %v2392_v30, %v855_v48  ;;  %1875 = vmatprep.mubr.bf16.mxu1 %v917_v41  ;;  %v2452_v39 = vadd.f32 %v891_v49, %v505_v62 }
 0x2a1   : > { %v1853_v50 = vpop.f32.mrf.mxu0  ;;  %1876 = vmatmul.mubr.bf16.gmra.mxu1 %v918_v45 }
 0x2a2   : > { %v892_v33 = vmax.f32 %v856_v25, 0.0  ;;  %v2448_v37 = vadd.f32 %v894_v24, %v508_v60  ;;  %v877_v51 = vadd.f32 %v1853_v50, %v2392_v30 }
 0x2a3   : > { %v868_v38 = vpop.f32.mrf.mxu0 }
 0x2a4   : > { %v2456_v40 = vadd.f32 %v892_v33, %v506_v63  ;;  %v869_v44 = vadd.f32 %v2392_v30, %v868_v38  ;;  %v920_v59 = vpack.c.bf16 %v2448_v37, %v2461_v47  ;;  %v897_v57 = vmax.f32 %v877_v51, 0.0 }
 0x2a5   : > { %v1854_v56 = vpop.f32.mrf.mxu0 }
 0x2a6   : > { %v880_v60 = vadd.f32 %v1854_v56, %v2392_v30  ;;  %v919_v55 = vpack.c.bf16 %v2456_v40, %v2452_v39  ;;  %v895_v63 = vmax.f32 %v869_v44, 0.0  ;;  %v2484_v4 = vadd.f32 %v897_v57, %v511_v13  ;;  %v2066_v13 = vld [vmem:[%s2634_s5 + $0x20] sm:$0xff]  }
 0x2a7   : > { %v871_v62 = vpop.f32.mrf.mxu0 }
 0x2a8   : > { %v898_v52 = vmax.f32 %v880_v60, 0.0  ;;  %v872_v53 = vadd.f32 %v2392_v30, %v871_v62  ;;  %1879 = vmatprep.mubr.bf16.mxu1 %v919_v55  ;;  %v2476_v58 = vadd.f32 %v895_v63, %v509_v11  ;;  %v2064_v11 = vld [vmem:[%s2634_s5 + $0x30] sm:$0xff]  }
 0x2a9   : > { %1880 = vmatmul.mubr.bf16.gmra.mxu1 %v920_v59  ;;  %1952 = vmatprep.subr.bf16.mxu1 %v2064_v11 }
 0x2aa   : > { %v896_v0 = vmax.f32 %v872_v53, 0.0  ;;  %v2472_v54 = vadd.f32 %v898_v52, %v512_v10  ;;  %v2060_v10 = vld [vmem:[#allocation2 + $0xd0] sm:$0xff]   ;;  %1960 = vmatpush3.bf16.msra.mxu1 %v2064_v11 }
 0x2ab   : > { %1897 = vmatprep.subr.bf16.mxu0 %v2060_v10 }
 0x2ac   : > { %v2480_v1 = vadd.f32 %v896_v0, %v510_v12  ;;  %v922_v6 = vpack.c.bf16 %v2472_v54, %v2484_v4  ;;  %1898 = vmatpush3.bf16.msra.mxu0 %v2060_v10  ;;  %v2065_v12 = vld [vmem:[%s2634_s5 + $0x28] sm:$0xff]  }
 0x2ad   : > { %1899 = vmatprep.subr.bf16.mxu0 %v2061_v5  ;;  %1953 = vmatprep.subr.bf16.mxu1 %v2065_v12 }
 0x2ae   : > { %v921_v30 = vpack.c.bf16 %v2480_v1, %v2476_v58  ;;  %1961 = vmatpush3.bf16.msra.mxu1 %v2065_v12 }
 0x2af   : > { %1954 = vmatprep.subr.bf16.mxu1 %v2066_v13 }
 0x2b0   : > { %1883 = vmatprep.mubr.bf16.mxu1 %v921_v30  ;;  %1900 = vmatpush3.bf16.msra.mxu0 %v2061_v5 }
 0x2b1   : > { %1884 = vmatmul.mubr.bf16.gmra.mxu1 %v922_v6  ;;  %1901 = vmatprep.subr.bf16.mxu0 %v2062_v9 }
 0x2b2   : > { %1962 = vmatpush3.bf16.msra.mxu1 %v2066_v13 }
 0x2b4   : > { %1902 = vmatpush3.bf16.msra.mxu0 %v2062_v9 }
 0x2b5   : > { %1919 = vmatprep.subr.bf16.mxu0 %v2063_v7 }
 0x359   : > { %v1873_v14 = vpop.f32.mrf.mxu1 }
 0x35a   : > { %v1039_v35 = vadd.f32 %v1873_v14, %v1647_v32 }
 0x35b   : > { %v1030_v28 = vpop.f32.mrf.mxu1 }
 0x35c   : > { %v1031_v34 = vadd.f32 %v1647_v32, %v1030_v28  ;;  %v1095_v22 = vmax.f32 %v1039_v35, 0.0 }
 0x35d   : > { %v1874_v27 = vpop.f32.mrf.mxu1 }
 0x35e   : > { %v1042_v31 = vadd.f32 %v1874_v27, %v1647_v32  ;;  %v1093_v17 = vmax.f32 %v1031_v34, 0.0 }
 0x35f   : > { %v1033_v15 = vpop.f32.mrf.mxu1 }
 0x360   : > { %v1034_v16 = vadd.f32 %v1647_v32, %v1033_v15  ;;  %v1096_v29 = vmax.f32 %v1042_v31, 0.0 }
 0x361   : > { %v1877_v36 = vpop.f32.mrf.mxu1 }
 0x362   : > { %v1094_v19 = vmax.f32 %v1034_v16, 0.0  ;;  %v1110_v46 = vpack.c.bf16 %v1096_v29, %v1095_v22  ;;  %v1055_v49 = vadd.f32 %v1877_v36, %v1647_v32 }
 0x363   : > { %v1046_v23 = vpop.f32.mrf.mxu1 }
 0x364   : > { %v1109_v42 = vpack.c.bf16 %v1094_v19, %v1093_v17  ;;  %v1047_v48 = vadd.f32 %v1647_v32, %v1046_v23  ;;  %v1099_v44 = vmax.f32 %v1055_v49, 0.0  ;;  %v2069_v17 = vld [vmem:[%s2634_s5 + $0x8] sm:$0xff]   ;;  %v2070_v19 = vld [vmem:[%s2634_s5] sm:$0xff]  }
 0x365   : > { %v1878_v41 = vpop.f32.mrf.mxu1  ;;  %v2520_v23 = vld [vmem:[%s2633_s4 + $0x3] ss:$0 sm:$0xff] }
 0x366   : > { %v1058_v45 = vadd.f32 %v1878_v41, %v1647_v32  ;;  %1903 = vmatprep.mubr.bf16.mxu0 %v1109_v42  ;;  %v1097_v33 = vmax.f32 %v1047_v48, 0.0 }
 0x367   : > { %v1049_v24 = vpop.f32.mrf.mxu1  ;;  %1904 = vmatmul.mubr.bf16.vlgmr.msra.gmra.mxu0 %v1110_v46 }
 0x368   : > { %v1050_v25 = vadd.f32 %v1647_v32, %v1049_v24  ;;  %1920 = vmatpush3.bf16.msra.mxu0 %v2063_v7  ;;  %v1100_v43 = vmax.f32 %v1058_v45, 0.0 }
 0x369   : > { %v1881_v50 = vpop.f32.mrf.mxu1  ;;  %1921 = vmatprep.subr.bf16.mxu0 %v2064_v11 }
 0x36a   : > { %v1098_v38 = vmax.f32 %v1050_v25, 0.0  ;;  %v1112_v60 = vpack.c.bf16 %v1100_v43, %v1099_v44  ;;  %v1071_v63 = vadd.f32 %v1881_v50, %v1647_v32 }
 0x36b   : > { %v1062_v51 = vpop.f32.mrf.mxu1 }
 0x36c   : > { %v1111_v56 = vpack.c.bf16 %v1098_v38, %v1097_v33  ;;  %1922 = vmatpush3.bf16.msra.mxu0 %v2064_v11  ;;  %v1063_v62 = vadd.f32 %v1647_v32, %v1062_v51  ;;  %v1103_v10 = vmax.f32 %v1071_v63, 0.0 }
 0x36d   : > { %v1882_v55 = vpop.f32.mrf.mxu1  ;;  %1923 = vmatprep.subr.bf16.mxu0 %v2065_v12 }
 0x36e   : > { %v1074_v59 = vadd.f32 %v1882_v55, %v1647_v32  ;;  %1907 = vmatprep.mubr.bf16.mxu0 %v1111_v56  ;;  %v1101_v30 = vmax.f32 %v1063_v62, 0.0 }
 0x36f   : > { %v1065_v52 = vpop.f32.mrf.mxu1  ;;  %1908 = vmatmul.mubr.bf16.gmra.mxu0 %v1112_v60 }
 0x370   : > { %v1066_v53 = vadd.f32 %v1647_v32, %v1065_v52  ;;  %1924 = vmatpush3.bf16.msra.mxu0 %v2065_v12  ;;  %v1104_v57 = vmax.f32 %v1074_v59, 0.0 }
 0x371   : > { %v1885_v0 = vpop.f32.mrf.mxu1  ;;  %1925 = vmatprep.subr.bf16.mxu0 %v2066_v13 }
 0x372   : > { %v1102_v6 = vmax.f32 %v1066_v53, 0.0  ;;  %v1114_v7 = vpack.c.bf16 %v1104_v57, %v1103_v10  ;;  %v1087_v27 = vadd.f32 %v1885_v0, %v1647_v32 }
 0x373   : > { %v1078_v5 = vpop.f32.mrf.mxu1 }
 0x374   : > { %v1113_v9 = vpack.c.bf16 %v1102_v6, %v1101_v30  ;;  %1926 = vmatpush3.bf16.msra.mxu0 %v2066_v13  ;;  %v1079_v14 = vadd.f32 %v1647_v32, %v1078_v5  ;;  %v1107_v16 = vmax.f32 %v1087_v27, 0.0  ;;  %v2067_v13 = vld [vmem:[%s2634_s5 + $0x18] sm:$0xff]  }
 0x375   : > { %v1886_v11 = vpop.f32.mrf.mxu1  ;;  %1927 = vmatprep.subr.bf16.mxu0 %v2067_v13  ;;  %1955 = vmatprep.subr.bf16.mxu1 %v2067_v13 }
 0x376   : > { %v1090_v28 = vadd.f32 %v1886_v11, %v1647_v32  ;;  %1911 = vmatprep.mubr.bf16.mxu0 %v1113_v9  ;;  %v1105_v12 = vmax.f32 %v1079_v14, 0.0  ;;  %1963 = vmatpush3.bf16.msra.mxu1 %v2067_v13 }
 0x377   : > { %v1081_v34 = vpop.f32.mrf.mxu1  ;;  %1912 = vmatmul.mubr.bf16.gmra.mxu0 %v1114_v7 }
 0x378   : > { %v1082_v31 = vadd.f32 %v1647_v32, %v1081_v34  ;;  %v1108_v35 = vmax.f32 %v1090_v28, 0.0  ;;  %1928 = vmatpush3.bf16.msra.mxu0 %v2067_v13  ;;  %v2068_v32 = vld [vmem:[%s2634_s5 + $0x10] sm:$0xff]  }
 0x379   : > { %1929 = vmatprep.subr.bf16.mxu0 %v2068_v32  ;;  %1956 = vmatprep.subr.bf16.mxu1 %v2068_v32 }
 0x37a   : > { %v1106_v15 = vmax.f32 %v1082_v31, 0.0  ;;  %v1116_v36 = vpack.c.bf16 %v1108_v35, %v1107_v16  ;;  %1964 = vmatpush3.bf16.msra.mxu1 %v2068_v32 }
 0x37b   : > { %1957 = vmatprep.subr.bf16.mxu1 %v2069_v17 }
 0x37c   : > { %v1115_v29 = vpack.c.bf16 %v1106_v15, %v1105_v12  ;;  %1930 = vmatpush3.bf16.msra.mxu0 %v2068_v32 }
 0x37d   : > { %1931 = vmatprep.subr.bf16.mxu0 %v2069_v17 }
 0x37e   : > { %1915 = vmatprep.mubr.bf16.mxu0 %v1115_v29  ;;  %1965 = vmatpush3.bf16.msra.mxu1 %v2069_v17 }
 0x37f   : > { %1916 = vmatmul.mubr.bf16.gmra.mxu0 %v1116_v36  ;;  %1958 = vmatprep.subr.bf16.mxu1 %v2070_v19 }
 0x380   : > { %1932 = vmatpush3.bf16.msra.mxu0 %v2069_v17 }
 0x381   : > { %1933 = vmatprep.subr.bf16.mxu0 %v2070_v19 }
 0x382   : > { %1966 = vmatpush3.bf16.msra.mxu1 %v2070_v19 }
 0x384   : > { %1934 = vmatpush3.bf16.msra.mxu0 %v2070_v19 }
 0x427   : > { %v1905_v22 = vpop.f32.mrf.mxu0 }
 0x428   : > { %v1233_v41 = vadd.f32 %v1905_v22, %v2520_v23 }
 0x429   : > { %v1224_v42 = vpop.f32.mrf.mxu0 }
 0x42a   : > { %v1225_v46 = vadd.f32 %v2520_v23, %v1224_v42  ;;  %v1289_v50 = vmax.f32 %v1233_v41, 0.0 }
 0x42b   : > { %v1906_v48 = vpop.f32.mrf.mxu0 }
 0x42c   : > { %v1236_v45 = vadd.f32 %v1906_v48, %v2520_v23  ;;  %v1287_v24 = vmax.f32 %v1225_v46, 0.0  ;;  %v1305_v62 = vadd.f32 %v1289_v50, %v2413_v8 }
 0x42d   : > { %v1227_v49 = vpop.f32.mrf.mxu0 }
 0x42e   : > { %v1290_v25 = vmax.f32 %v1236_v45, 0.0  ;;  %v1228_v43 = vadd.f32 %v2520_v23, %v1227_v49  ;;  %v1303_v56 = vadd.f32 %v1287_v24, %v2404_v2 }
 0x42f   : > { %v1909_v33 = vpop.f32.mrf.mxu0 }
 0x430   : > { %v1288_v38 = vmax.f32 %v1228_v43, 0.0  ;;  %v1306_v44 = vadd.f32 %v1290_v25, %v2400_v61  ;;  %v1249_v59 = vadd.f32 %v1909_v33, %v2520_v23 }
 0x431   : > { %v1240_v51 = vpop.f32.mrf.mxu0 }
 0x432   : > { %v1304_v60 = vadd.f32 %v1288_v38, %v2408_v3  ;;  %v1241_v55 = vadd.f32 %v2520_v23, %v1240_v51  ;;  %v1320_v57 = vpack.c.bf16 %v1306_v44, %v1305_v62  ;;  %v1293_v2 = vmax.f32 %v1249_v59, 0.0 }
 0x433   : > { %v1910_v63 = vpop.f32.mrf.mxu0 }
 0x434   : > { %v1252_v52 = vadd.f32 %v1910_v63, %v2520_v23  ;;  %v1319_v53 = vpack.c.bf16 %v1304_v60, %v1303_v56  ;;  %v1291_v30 = vmax.f32 %v1241_v55, 0.0  ;;  %v1309_v14 = vadd.f32 %v1293_v2, %v2437_v26 }
 0x435   : > { %v1243_v0 = vpop.f32.mrf.mxu0 }
 0x436   : > { %v1294_v6 = vmax.f32 %v1252_v52, 0.0  ;;  %v1244_v61 = vadd.f32 %v2520_v23, %v1243_v0  ;;  %1935 = vmatprep.mubr.bf16.mxu0 %v1319_v53  ;;  %v1307_v9 = vadd.f32 %v1291_v30, %v2428_v20 }
 0x437   : > { %v1913_v10 = vpop.f32.mrf.mxu0  ;;  %1936 = vmatmul.mubr.bf16.vlgmr.msra.gmra.mxu0 %v1320_v57 }
 0x438   : > { %v1292_v3 = vmax.f32 %v1244_v61, 0.0  ;;  %v1310_v5 = vadd.f32 %v1294_v6, %v2424_v18  ;;  %v1265_v28 = vadd.f32 %v1913_v10, %v2520_v23 }
 0x439   : > { %v1256_v8 = vpop.f32.mrf.mxu0 }
 0x43a   : > { %v1308_v7 = vadd.f32 %v1292_v3, %v2432_v21  ;;  %v1257_v11 = vadd.f32 %v2520_v23, %v1256_v8  ;;  %v1322_v35 = vpack.c.bf16 %v1310_v5, %v1309_v14  ;;  %v1297_v20 = vmax.f32 %v1265_v28, 0.0 }
 0x43b   : > { %v1914_v27 = vpop.f32.mrf.mxu0 }
 0x43c   : > { %v1268_v34 = vadd.f32 %v1914_v27, %v2520_v23  ;;  %v1321_v31 = vpack.c.bf16 %v1308_v7, %v1307_v9  ;;  %v1295_v15 = vmax.f32 %v1257_v11, 0.0  ;;  %v1313_v19 = vadd.f32 %v1297_v20, %v2461_v47 }
 0x43d   : > { %v1259_v12 = vpop.f32.mrf.mxu0 }
 0x43e   : > { %v1298_v16 = vmax.f32 %v1268_v34, 0.0  ;;  %v1260_v18 = vadd.f32 %v2520_v23, %v1259_v12  ;;  %1939 = vmatprep.mubr.bf16.mxu1 %v1321_v31  ;;  %v1311_v13 = vadd.f32 %v1295_v15, %v2452_v39 }
 0x43f   : > { %v1917_v29 = vpop.f32.mrf.mxu0  ;;  %1940 = vmatmul.mubr.bf16.vlgmr.msra.gmra.mxu1 %v1322_v35 }
 0x440   : > { %v1296_v21 = vmax.f32 %v1260_v18, 0.0  ;;  %v1314_v36 = vadd.f32 %v1298_v16, %v2448_v37  ;;  %v1281_v22 = vadd.f32 %v1917_v29, %v2520_v23 }
 0x441   : > { %v1272_v26 = vpop.f32.mrf.mxu0 }
 0x442   : > { %v1312_v32 = vadd.f32 %v1296_v21, %v2456_v40  ;;  %v1273_v17 = vadd.f32 %v2520_v23, %v1272_v26  ;;  %v1324_v45 = vpack.c.bf16 %v1314_v36, %v1313_v19  ;;  %v1301_v40 = vmax.f32 %v1281_v22, 0.0 }
 0x443   : > { %v1918_v42 = vpop.f32.mrf.mxu0 }
 0x444   : > { %v1284_v46 = vadd.f32 %v1918_v42, %v2520_v23  ;;  %v1323_v41 = vpack.c.bf16 %v1312_v32, %v1311_v13  ;;  %v1299_v49 = vmax.f32 %v1273_v17, 0.0  ;;  %v1317_v50 = vadd.f32 %v1301_v40, %v2484_v4 }
 0x445   : > { %v1275_v48 = vpop.f32.mrf.mxu0 }
 0x446   : > { %v1302_v37 = vmax.f32 %v1284_v46, 0.0  ;;  %v1276_v39 = vadd.f32 %v2520_v23, %v1275_v48  ;;  %1943 = vmatprep.mubr.bf16.mxu1 %v1323_v41  ;;  %v1315_v25 = vadd.f32 %v1299_v49, %v2476_v58  ;;  %v1666_v23 = vld [vmem:[%s2635_s6] ss:$0 sm:$0xff] }
 0x447   : > { %1944 = vmatmul.mubr.bf16.gmra.mxu1 %v1324_v45 }
 0x448   : > { %v1300_v24 = vmax.f32 %v1276_v39, 0.0  ;;  %v1318_v47 = vadd.f32 %v1302_v37, %v2472_v54 }
 0x44a   : > { %v1316_v43 = vadd.f32 %v1300_v24, %v2480_v1  ;;  %v1326_v38 = vpack.c.bf16 %v1318_v47, %v1317_v50 }
 0x44c   : > { %v1325_v33 = vpack.c.bf16 %v1316_v43, %v1315_v25 }
 0x44e   : > { %1947 = vmatprep.mubr.bf16.mxu1 %v1325_v33 }
 0x44f   : > { %1948 = vmatmul.mubr.bf16.gmra.mxu1 %v1326_v38 }
 0x4f7   : > { %v1937_v44 = vpop.f32.mrf.mxu0 }
 0x4f8   : > { %v1441_v51 = vadd.f32 %v1937_v44, %v1666_v23 }
 0x4f9   : > { %v1432_v54 = vpop.f32.mrf.mxu0 }
 0x4fa   : > { %1497 = vst [vmem:[%s2560_s18 + $0x10] sm:$0xff] %v1441_v51  ;;  %v1433_v58 = vadd.f32 %v1666_v23, %v1432_v54 }
 0x4fb   : > { %v1938_v1 = vpop.f32.mrf.mxu0 }
 0x4fc   : > { %1495 = vst [vmem:[%s2560_s18] sm:$0xff] %v1433_v58  ;;  %v1444_v4 = vadd.f32 %v1938_v1, %v1666_v23 }
 0x4fd   : > { %v1435_v56 = vpop.f32.mrf.mxu0 }
 0x4fe   : > { %1498 = vst [vmem:[%s2560_s18 + $0x18] sm:$0xff] %v1444_v4  ;;  %v1436_v60 = vadd.f32 %v1666_v23, %v1435_v56 }
 0x4ff   : > { %v1941_v55 = vpop.f32.mrf.mxu1 }
 0x500   : > { %1496 = vst [vmem:[%s2560_s18 + $0x8] sm:$0xff] %v1436_v60  ;;  %v1457_v62 = vadd.f32 %v1941_v55, %v1666_v23 }
 0x501   : > { %v1448_v59 = vpop.f32.mrf.mxu1 }
 0x502   : > { %1501 = vst [vmem:[%s2560_s18 + $0x30] sm:$0xff] %v1457_v62  ;;  %v1449_v63 = vadd.f32 %v1666_v23, %v1448_v59 }
 0x503   : > { %v1942_v52 = vpop.f32.mrf.mxu1 }
 0x504   : > { %1499 = vst [vmem:[%s2560_s18 + $0x20] sm:$0xff] %v1449_v63  ;;  %v1460_v53 = vadd.f32 %v1942_v52, %v1666_v23 }
 0x505   : > { %v1451_v57 = vpop.f32.mrf.mxu1 }
 0x506   : > { %1502 = vst [vmem:[%s2560_s18 + $0x38] sm:$0xff] %v1460_v53  ;;  %v1452_v0 = vadd.f32 %v1666_v23, %v1451_v57 }
 0x507   : > { %v1945_v30 = vpop.f32.mrf.mxu1 }
 0x508   : > { %1500 = vst [vmem:[%s2560_s18 + $0x28] sm:$0xff] %v1452_v0  ;;  %v1473_v6 = vadd.f32 %v1945_v30, %v1666_v23 }
 0x509   : > { %v1464_v61 = vpop.f32.mrf.mxu1 }
 0x50a   : > { %1505 = vst [vmem:[%s2560_s18 + $0x50] sm:$0xff] %v1473_v6  ;;  %v1465_v2 = vadd.f32 %v1666_v23, %v1464_v61 }
 0x50b   : > { %v1946_v10 = vpop.f32.mrf.mxu1 }
 0x50c   : > { %1503 = vst [vmem:[%s2560_s18 + $0x40] sm:$0xff] %v1465_v2  ;;  %v1476_v3 = vadd.f32 %v1946_v10, %v1666_v23 }
 0x50d   : > { %v1467_v5 = vpop.f32.mrf.mxu1 }
 0x50e   : > { %1506 = vst [vmem:[%s2560_s18 + $0x58] sm:$0xff] %v1476_v3  ;;  %v1468_v8 = vadd.f32 %v1666_v23, %v1467_v5 }
 0x50f   : > { %v1949_v9 = vpop.f32.mrf.mxu1 }
 0x510   : > { %1504 = vst [vmem:[%s2560_s18 + $0x48] sm:$0xff] %v1468_v8  ;;  %v1489_v7 = vadd.f32 %v1949_v9, %v1666_v23 }
 0x511   : > { %v1480_v11 = vpop.f32.mrf.mxu1 }
 0x512   : > { %1509 = vst [vmem:[%s2560_s18 + $0x70] sm:$0xff] %v1489_v7  ;;  %v1481_v14 = vadd.f32 %v1666_v23, %v1480_v11 }
 0x513   : > { %v1950_v28 = vpop.f32.mrf.mxu1 }
 0x514   : > { %1507 = vst [vmem:[%s2560_s18 + $0x60] sm:$0xff] %v1481_v14  ;;  %v1492_v27 = vadd.f32 %v1950_v28, %v1666_v23 }
 0x515   : > { %v1483_v34 = vpop.f32.mrf.mxu1 }
 0x516   : > { %1510 = vst [vmem:[%s2560_s18 + $0x78] sm:$0xff] %v1492_v27  ;;  %v1484_v31 = vadd.f32 %v1666_v23, %v1483_v34 }
 0x518   : > { %1508 = vst [vmem:[%s2560_s18 + $0x68] sm:$0xff] %v1484_v31 }
 0x519   : > { %2110 = shalt.err (!%p2107_p0)
}
 0x51a   : > { %s2111_s13 = scalar_lea.hbm %s2581_s23, 2048  ;;  %s2115_s17 = scalar_lea.hbm %s2636_s7, 4096 }
 0x51b   : > { %p2112_p1 = scmp.ne.s32.totalorder %s2581_s23, %s2111_s13  ;;  %p2116_p4 = scmp.lt.s32.totalorder %s2581_s23, %s2636_s7 }
 0x51c   : > { %p2117_p7 = scmp.lt.s32.totalorder %s2115_s17, %s2111_s13 }
 0x51d   : > { %p2113_p2 = pnand %p2112_p1, %p2247_p5 }
 0x51e   : > { %p2118_p8 = por %p2117_p7, %p2116_p4 }
 0x51f   : > { %p2114_p3 = pneg %p2113_p2 }
 0x521   : > { %p2119_p6 = pnand %p2118_p8, %p2114_p3 }
 0x523   : > { %2122 = shalt.err (!%p2119_p6)
}
 0x524   : > { %s2167_s21 = smov 128   ;;  %s2168_s22 = smov 8  }
 0x525   : > { %1971 = dma.vmem_to_hbm [thread:$0]  (%p2247_p5), %s2583_s20, 2048, %s2581_s23, %s2589_s28, %s2167_s21, %s2167_s21, %s2168_s22  }
 0x526 PF: > { %p1983_p9 = scmp.ge.s32.totalorder %s2161_s27, 2  ;;  %s1540_s29 = sand.u32 1, %s2149_s24  }
 0x527   : > { %p2640_p10 = scmp.ne.s32.totalorder %s2638_s12, 0  ;;  %s1541_s8 = scalar_lea.sflag [#allocation4], %s1540_s29 }
 0x529   : > { %p1978_p11 = pnand %p1983_p9, %p2640_p10 }
 0x52b   : > { %p1979_p12 = pneg %p1978_p11 }
 0x52d   : > { %2144 = dma.done.wait (%p1979_p12), %s1541_s8, 2048  }
 0x52e   : > { %2146 = vsyncadd (%p1979_p12), %s1541_s8, 4294965248  ;;  %p18_p13 = scmp.ge.s32.totalorder %s2234_s30, 4   ;;  %s2641_s24 = smov %s2153_s25 }
 0x52f   : > { %s2642_s25 = smov %s2157_s26  ;;  %s2643_s26 = smov %s2245_s10 }
 0x530   : > { %s2644_s27 = smov %s2234_s30  ;;  %20 = sbr.rel (!%p18_p13) target bundleno = 4 (0x4), region = 94 }
 0x535   :  { %1546 = vsyncpa [#allocation3], 1 }
 0x536   :  { %1548 = vsyncpa [#allocation3 + $0x1], 1 }
 0x537   :  { %1549 = vsyncpa [#allocation4], 1 }
 0x538   :  { %1551 = vsyncpa [#allocation4 + $0x1], 1 }

// kernel: tpu_custom_call.1
= control target key start
LH: loop header
LB: loop body
LE: loop exit
PB: predicated region body
PF: predicated region fallthrough
CT: control target
= control target key end

     0   :  { %12 = vsyncpa [#allocation3], 0  ;;  %s2629_s0 = inlined_call_operand.vmem [shape: bf16[256,32], index: 0, kind: input, shape index: {}]   ;;  %s2630_s1 = inlined_call_operand.vmem [shape: bf16[32,128], index: 1, kind: input, shape index: {}]   ;;  %s2631_s2 = inlined_call_operand.vmem [shape: f32[1,128], index: 2, kind: input, shape index: {}]   ;;  %s2632_s3 = inlined_call_operand.hbm [shape: bf16[2,2,128,128], index: 3, kind: input, shape index: {}]   ;;  %s2633_s4 = inlined_call_operand.vmem [shape: f32[2,2,1,128], index: 4, kind: input, shape index: {}]   ;;  %s2634_s5 = inlined_call_operand.vmem [shape: bf16[128,128], index: 5, kind: input, shape index: {}]   ;;  %s2635_s6 = inlined_call_operand.vmem [shape: f32[1,128], index: 6, kind: input, shape index: {}]   ;;  %s2636_s7 = inlined_call_operand.hbm [shape: f32[256,128], index: 7, kind: output, shape index: {}]  }
   0x1   :  { %13 = vsyncpa [#allocation4], 0 }
   0x2   :  { %15 = vsyncpa [#allocation4 + $0x1], 0  ;;  %s2209_s24 = smov 0   ;;  %s2211_s25 = smov 0  }
   0x3   :  { %s2213_s26 = smov 0   ;;  %s2215_s27 = smov 0  }
   0x4 LB: > { %s2230_s28 = sadd.s32 4294967295, %s2161_s27   ;;  %s1599_s29 = sadd.s32 4294967294, %s2161_s27   ;;  %s2161_s27 = sphi %s2215_s27, %s2644_s27   ;;  %s2157_s26 = sphi %s2213_s26, %s2643_s26   ;;  %s2153_s25 = sphi %s2211_s25, %s2642_s25   ;;  %s2149_s24 = sphi %s2209_s24, %s2641_s24  }
   0x5   : > { %s2234_s30 = sadd.s32 1, %s2161_s27   ;;  %s180_s8 = sadd.s32 1, %s2157_s26 }
   0x6   : > { %s177_s9 = ssub.s32 %s2161_s27, %s2234_s30  ;;  %p190_p0 = scmp.ne.s32.totalorder %s2157_s26, %s2153_s25 }
   0x7   : > { %p178_p1 = scmp.eq.s32.totalorder %s177_s9, 0  ;;  %p191_p2 = scmp.eq.s32.totalorder %s2230_s28, 1 }
   0x8   : > { %p196_p3 = scmp.ne.s32.totalorder %s2153_s25, %s2149_s24  ;;  %p197_p4 = scmp.eq.s32.totalorder %s1599_s29, 1 }
   0x9   : > { %s2245_s10 = scalar_select %p178_p1, %s2157_s26, %s180_s8  }
   0xa   : > { %p2247_p5 = por %p191_p2, %p190_p0  ;;  %p2251_p6 = por %p197_p4, %p196_p3 }
   0xb   : > { %p1600_p7 = scmp.ge.s32.totalorder %s2161_s27, 1  ;;  %p204_p8 = scmp.lt.s32.totalorder %s2161_s27, 3 }
   0xc   : > { %s2638_s12 = scalar_select %p2251_p6, 1, 0 }
   0xd   : > { %p1981_p9 = scmp.eq.s32.totalorder %s2230_s28, 0  ;;  %p2258_p10 = pnand %p1600_p7, %p204_p8 }
   0xe   : > { %s2163_s14 = smov [#allocation2]  }
   0xf   : > { %s222_s15 = sshll.u32 %s2163_s14, 4  ;;  %p1973_p11 = pneg %p2258_p10  ;;  %s223_s15 = int_to_ptr.vmem [resolvable:$true] %s222_s15 }
  0x10   : > { %s2082_s16 = scalar_lea.vmem %s223_s15, 4096  ;;  %p2090_p3 = scmp.lt.s32.totalorder %s223_s15, %s223_s15 }
  0x11   : > { %p1974_p12 = pnand %p1981_p9, %p1973_p11  ;;  %p2083_p0 = scmp.ne.s32.totalorder %s223_s15, %s2082_s16 }
  0x12   : > { %p2091_p4 = scmp.lt.s32.totalorder %s2082_s16, %s2082_s16 }
  0x13   : > { %p2073_p13 = pneg %p1974_p12 }
  0x14   : > { %p2092_p6 = por %p2091_p4, %p2090_p3 }
  0x15   : > { %p2085_p1 = pnand %p2083_p0, %p2073_p13 }
  0x17   : > { %p2086_p2 = pneg %p2085_p1 }
  0x19   : > { %p2093_p7 = pnand %p2092_p6, %p2086_p2 }
  0x1b   : > { %2096 = shalt.err (!%p2093_p7)
}
  0x1c   : > { %s2164_s17 = smov 64   ;;  %s2165_s18 = smov 4  }
  0x1d   : > { %1976 = dma.hbm_to_vmem [thread:$0]  (!%p1974_p12), %s2632_s3, 4096, %s223_s15, [#allocation3], %s2164_s17, %s2164_s17, %s2165_s18  }
  0x1e   : > { %256 = sbr.rel (%p2258_p10) target bundleno = 1318 (0x526), region = 48 }
  0x23   : > { %2140 = dma.done.wait (%p1981_p9), [#allocation3], 4096  }
  0x24   : > { %2142 = vsyncadd (%p1981_p9), [#allocation3], 4294963200  ;;  %s1606_s21 = sshll.u32 %s2230_s28, 4  ;;  %v2021_v0 = vld [vmem:[%s2630_s1 + $0x8] sm:$0xff]   ;;  %v2022_v1 = vld [vmem:[%s2630_s1] sm:$0xff]   ;;  %vm375_vm0 = vcmask 261120  }
  0x25   : > { %p289_p8 = scmp.lt.s32.totalorder %s1606_s21, 31  ;;  %1771 = vmatprep.subr.bf16.mxu0 %v2021_v0  ;;  %v2031_v5 = vld [vmem:[#allocation2 + $0x38] sm:$0xff]   ;;  %v2032_v6 = vld [vmem:[#allocation2 + $0x30] sm:$0xff]   ;;  %v2033_v9 = vld [vmem:[#allocation2 + $0x28] sm:$0xff]   ;;  %s285_s13 = sand.u32 1, %s2153_s25  }
  0x26   : > { %1772 = vmatpush3.bf16.msra.mxu0 %v2021_v0  ;;  %1791 = vmatprep.subr.bf16.mxu1 %v2031_v5  ;;  %v2034_v10 = vld [vmem:[#allocation2 + $0x20] sm:$0xff]   ;;  %v2035_v12 = vld [vmem:[#allocation2 + $0x18] sm:$0xff]   ;;  %v2036_v15 = vld [vmem:[#allocation2 + $0x10] sm:$0xff]   ;;  %s1605_s15 = sshll.u32 %s285_s13, 7  ;;  %s1680_s19 = sshll.u32 %s2230_s28, 11 }
  0x27   : > { %s2646_s21 = smov (!%p289_p8, %s1606_s21), 31  ;;  %1773 = vmatprep.subr.bf16.mxu0 %v2022_v1  ;;  %1792 = vmatpush3.bf16.msra.mxu1 %v2031_v5  ;;  %v2037_v16 = vld [vmem:[#allocation2 + $0x8] sm:$0xff]   ;;  %v2038_v17 = vld [vmem:[#allocation2] sm:$0xff]   ;;  %v2039_v18 = vld [vmem:[#allocation2 + $0x78] sm:$0xff]   ;;  %s2560_s18 = scalar_lea.vmem [#allocation5], %s1605_s15 }
  0x28   : > { %s1607_s22 = sshll.u32 %s2646_s21, 2  ;;  %1793 = vmatprep.subr.bf16.mxu1 %v2032_v6  ;;  %v2040_v19 = vld [vmem:[#allocation2 + $0x70] sm:$0xff]   ;;  %v2041_v20 = vld [vmem:[#allocation2 + $0x68] sm:$0xff]   ;;  %v2042_v21 = vld [vmem:[#allocation2 + $0x60] sm:$0xff]   ;;  %s1525_s20 = sshll.u32 %s2560_s18, 4  ;;  %s2583_s20 = int_to_ptr.vmem [resolvable:$true] %s1525_s20 }
  0x29   : > { %s2279_s8 = scalar_lea.vmem %s2629_s0, %s1607_s22  ;;  %v2043_v22 = vld [vmem:[#allocation2 + $0x58] sm:$0xff]   ;;  %v1608_v25 = vld [vmem:[%s2631_s2] ss:$0 sm:$0xff]  ;;  %s2581_s23 = scalar_lea.hbm %s2636_s7, %s1680_s19 }
  0x2a   : > { %v2023_v2 = vld [vmem:[%s2279_s8] sm:$0xff]   ;;  %v2024_v3 = vld [vmem:[%s2279_s8 + $0x8] sm:$0xff]   ;;  %1774 = vmatpush3.bf16.msra.mxu0 %v2022_v1  ;;  %v2025_v4 = vld [vmem:[%s2279_s8 + $0x10] sm:$0xff]   ;;  %s2589_s28 = scalar_lea.sflag [#allocation4], %s285_s13  ;;  %s2097_s29 = scalar_lea.vmem %s2583_s20, 2048 }
  0x2b   : > { %1775 = vmatprep.mubr.msk.bf16.mxu0 %vm375_vm0, %v2023_v2  ;;  %v2026_v7 = vld [vmem:[%s2279_s8 + $0x18] sm:$0xff]   ;;  %v2027_v8 = vld [vmem:[%s2279_s8 + $0x20] sm:$0xff]   ;;  %1794 = vmatpush3.bf16.msra.mxu1 %v2032_v6  ;;  %v2028_v11 = vld [vmem:[%s2279_s8 + $0x28] sm:$0xff]   ;;  %p2098_p6 = scmp.ne.s32.totalorder %s2583_s20, %s2097_s29 }
  0x2c   : > { %1795 = vmatprep.subr.bf16.mxu1 %v2033_v9  ;;  %v2029_v13 = vld [vmem:[%s2279_s8 + $0x30] sm:$0xff]   ;;  %v2030_v14 = vld [vmem:[%s2279_s8 + $0x38] sm:$0xff]   ;;  %1823 = vmatprep.subr.bf16.mxu0 %v2039_v18  ;;  %s2166_s8 = smov [#allocation5]  }
  0x2d   : > { %1776 = vmatmul.mubr.msk.bf16.vlgmr.msra.gmra.mxu0 %vm375_vm0, %v2024_v3  ;;  %p2099_p9 = pnand %p2098_p6, %p2247_p5  ;;  %s2101_s9 = sshll.u32 %s2166_s8, 4  ;;  %s2102_s9 = int_to_ptr.vmem [resolvable:$false] %s2101_s9 }
  0x2e   : > { %1779 = vmatprep.mubr.msk.bf16.mxu0 %vm375_vm0, %v2025_v4  ;;  %1824 = vmatpush3.bf16.msra.mxu0 %v2039_v18  ;;  %v2046_v18 = vld [vmem:[#allocation2 + $0x40] sm:$0xff]   ;;  %s2103_s14 = scalar_lea.vmem %s2102_s9, 4096  ;;  %p2104_p11 = scmp.lt.s32.totalorder %s2583_s20, %s2102_s9 }
  0x2f   : > { %1796 = vmatpush3.bf16.msra.mxu1 %v2033_v9  ;;  %1825 = vmatprep.subr.bf16.mxu0 %v2040_v19  ;;  %p2100_p10 = pneg %p2099_p9  ;;  %p2105_p12 = scmp.lt.s32.totalorder %s2103_s14, %s2097_s29 }
  0x30   : > { %1797 = vmatprep.subr.bf16.mxu1 %v2034_v10 }
  0x31   : > { %p2106_p13 = por %p2105_p12, %p2104_p11 }
  0x32   : > { %1826 = vmatpush3.bf16.msra.mxu0 %v2040_v19  ;;  %v2047_v19 = vld [vmem:[#allocation2 + $0xb8] sm:$0xff]  }
  0x33   : > { %1798 = vmatpush3.bf16.msra.mxu1 %v2034_v10  ;;  %1827 = vmatprep.subr.bf16.mxu0 %v2041_v20  ;;  %p2107_p0 = pnand %p2106_p13, %p2100_p10 }
  0x34   : > { %1799 = vmatprep.subr.bf16.mxu1 %v2035_v12 }
  0x35   : > { %1780 = vmatmul.mubr.msk.bf16.gmra.mxu0 %vm375_vm0, %v2026_v7 }
  0x36   : > { %1783 = vmatprep.mubr.msk.bf16.mxu0 %vm375_vm0, %v2027_v8  ;;  %1828 = vmatpush3.bf16.msra.mxu0 %v2041_v20  ;;  %v2048_v20 = vld [vmem:[#allocation2 + $0xb0] sm:$0xff]  }
  0x37   : > { %1800 = vmatpush3.bf16.msra.mxu1 %v2035_v12  ;;  %1829 = vmatprep.subr.bf16.mxu0 %v2042_v21 }
  0x38   : > { %1801 = vmatprep.subr.bf16.mxu1 %v2036_v15 }
  0x3a   : > { %1830 = vmatpush3.bf16.msra.mxu0 %v2042_v21  ;;  %v2049_v21 = vld [vmem:[#allocation2 + $0xa8] sm:$0xff]  }
  0x3b   : > { %1802 = vmatpush3.bf16.msra.mxu1 %v2036_v15  ;;  %1831 = vmatprep.subr.bf16.mxu0 %v2043_v22 }
  0x3c   : > { %1803 = vmatprep.subr.bf16.mxu1 %v2037_v16 }
  0x3d   : > { %1784 = vmatmul.mubr.msk.bf16.gmra.mxu0 %vm375_vm0, %v2028_v11 }
  0x3e   : > { %1787 = vmatprep.mubr.msk.bf16.mxu0 %vm375_vm0, %v2029_v13  ;;  %1832 = vmatpush3.bf16.msra.mxu0 %v2043_v22  ;;  %v2050_v22 = vld [vmem:[#allocation2 + $0xa0] sm:$0xff]  }
  0x3f   : > { %1804 = vmatpush3.bf16.msra.mxu1 %v2037_v16  ;;  %v2044_v16 = vld [vmem:[#allocation2 + $0x50] sm:$0xff]  }
  0x40   : > { %1805 = vmatprep.subr.bf16.mxu1 %v2038_v17  ;;  %1833 = vmatprep.subr.bf16.mxu0 %v2044_v16 }
  0x42   : > { %1834 = vmatpush3.bf16.msra.mxu0 %v2044_v16 }
  0x43   : > { %1806 = vmatpush3.bf16.msra.mxu1 %v2038_v17  ;;  %v2045_v17 = vld [vmem:[#allocation2 + $0x48] sm:$0xff]  }
  0x44   : > { %1835 = vmatprep.subr.bf16.mxu0 %v2045_v17  ;;  %1855 = vmatprep.subr.bf16.mxu1 %v2047_v19 }
  0x45   : > { %1788 = vmatmul.mubr.msk.bf16.gmra.mxu0 %vm375_vm0, %v2030_v14 }
  0x46   : > { %1836 = vmatpush3.bf16.msra.mxu0 %v2045_v17 }
  0x47   : > { %1837 = vmatprep.subr.bf16.mxu0 %v2046_v18 }
  0x4a   : > { %1838 = vmatpush3.bf16.msra.mxu0 %v2046_v18 }
  0xed   : > { %v1777_v23 = vpop.f32.mrf.mxu0 }
  0xee   : > { %v2310_v29 = vadd.f32 %v1777_v23, %v1608_v25  ;;  %v2051_v23 = vld [vmem:[#allocation2 + $0x98] sm:$0xff]  }
  0xef   : > { %v434_v24 = vpop.f32.mrf.mxu0 }
  0xf0   : > { %v2306_v27 = vadd.f32 %v1608_v25, %v434_v24  ;;  %v499_v36 = vmax.f32 %v2310_v29, 0.0 }
  0xf1   : > { %v1778_v26 = vpop.f32.mrf.mxu0 }
  0xf2   : > { %v2308_v28 = vadd.f32 %v1778_v26, %v1608_v25  ;;  %v497_v34 = vmax.f32 %v2306_v27, 0.0  ;;  %v1627_v26 = vld [vmem:[%s2633_s4] ss:$0 sm:$0xff] }
  0xf3   : > { %v437_v30 = vpop.f32.mrf.mxu0 }
  0xf4   : > { %v2312_v31 = vadd.f32 %v1608_v25, %v437_v30  ;;  %v500_v32 = vmax.f32 %v2308_v28, 0.0 }
  0xf5   : > { %v1781_v33 = vpop.f32.mrf.mxu0 }
  0xf6   : > { %v498_v35 = vmax.f32 %v2312_v31, 0.0  ;;  %v514_v39 = vpack.c.bf16 %v500_v32, %v499_v36  ;;  %v2330_v43 = vadd.f32 %v1781_v33, %v1608_v25 }
  0xf7   : > { %v450_v37 = vpop.f32.mrf.mxu0 }
  0xf8   : > { %v513_v38 = vpack.c.bf16 %v498_v35, %v497_v34  ;;  %v2326_v41 = vadd.f32 %v1608_v25, %v450_v37  ;;  %v503_v50 = vmax.f32 %v2330_v43, 0.0 }
  0xf9   : > { %v1782_v40 = vpop.f32.mrf.mxu0 }
  0xfa   : > { %v2328_v42 = vadd.f32 %v1782_v40, %v1608_v25  ;;  %1807 = vmatprep.mubr.bf16.mxu1 %v513_v38  ;;  %v501_v48 = vmax.f32 %v2326_v41, 0.0 }
  0xfb   : > { %v453_v44 = vpop.f32.mrf.mxu0  ;;  %1808 = vmatmul.mubr.bf16.vlgmr.msra.gmra.mxu1 %v514_v39 }
  0xfc   : > { %v2332_v45 = vadd.f32 %v1608_v25, %v453_v44  ;;  %v504_v46 = vmax.f32 %v2328_v42, 0.0  ;;  %1856 = vmatpush3.bf16.msra.mxu1 %v2047_v19 }
  0xfd   : > { %v1785_v47 = vpop.f32.mrf.mxu0  ;;  %1857 = vmatprep.subr.bf16.mxu1 %v2048_v20 }
  0xfe   : > { %v502_v49 = vmax.f32 %v2332_v45, 0.0  ;;  %v516_v53 = vpack.c.bf16 %v504_v46, %v503_v50  ;;  %v2350_v57 = vadd.f32 %v1785_v47, %v1608_v25 }
  0xff   : > { %v466_v51 = vpop.f32.mrf.mxu0 }
 0x100   : > { %v515_v52 = vpack.c.bf16 %v502_v49, %v501_v48  ;;  %v2346_v55 = vadd.f32 %v1608_v25, %v466_v51  ;;  %v507_v0 = vmax.f32 %v2350_v57, 0.0  ;;  %1858 = vmatpush3.bf16.msra.mxu1 %v2048_v20 }
 0x101   : > { %v1786_v54 = vpop.f32.mrf.mxu0  ;;  %1859 = vmatprep.subr.bf16.mxu1 %v2049_v21 }
 0x102   : > { %v2348_v56 = vadd.f32 %v1786_v54, %v1608_v25  ;;  %1811 = vmatprep.mubr.bf16.mxu1 %v515_v52  ;;  %v505_v62 = vmax.f32 %v2346_v55, 0.0 }
 0x103   : > { %v469_v58 = vpop.f32.mrf.mxu0  ;;  %1812 = vmatmul.mubr.bf16.gmra.mxu1 %v516_v53 }
 0x104   : > { %v2352_v59 = vadd.f32 %v1608_v25, %v469_v58  ;;  %v508_v60 = vmax.f32 %v2348_v56, 0.0  ;;  %1860 = vmatpush3.bf16.msra.mxu1 %v2049_v21 }
 0x105   : > { %v1789_v61 = vpop.f32.mrf.mxu0  ;;  %1861 = vmatprep.subr.bf16.mxu1 %v2050_v22 }
 0x106   : > { %v506_v63 = vmax.f32 %v2352_v59, 0.0  ;;  %v518_v3 = vpack.c.bf16 %v508_v60, %v507_v0  ;;  %v2370_v7 = vadd.f32 %v1789_v61, %v1608_v25 }
 0x107   : > { %v482_v1 = vpop.f32.mrf.mxu0 }
 0x108   : > { %v517_v2 = vpack.c.bf16 %v506_v63, %v505_v62  ;;  %v2366_v5 = vadd.f32 %v1608_v25, %v482_v1  ;;  %v511_v13 = vmax.f32 %v2370_v7, 0.0  ;;  %1862 = vmatpush3.bf16.msra.mxu1 %v2050_v22  ;;  %v2063_v7 = vld [vmem:[%s2634_s5 + $0x38] sm:$0xff]  }
 0x109   : > { %v1790_v4 = vpop.f32.mrf.mxu0  ;;  %1863 = vmatprep.subr.bf16.mxu1 %v2051_v23 }
 0x10a   : > { %v2368_v6 = vadd.f32 %v1790_v4, %v1608_v25  ;;  %1815 = vmatprep.mubr.bf16.mxu1 %v517_v2  ;;  %v509_v11 = vmax.f32 %v2366_v5, 0.0  ;;  %v2061_v5 = vld [vmem:[#allocation2 + $0xc8] sm:$0xff]  }
 0x10b   : > { %v485_v8 = vpop.f32.mrf.mxu0  ;;  %1816 = vmatmul.mubr.bf16.gmra.mxu1 %v518_v3 }
 0x10c   : > { %v2372_v9 = vadd.f32 %v1608_v25, %v485_v8  ;;  %v512_v10 = vmax.f32 %v2368_v6, 0.0  ;;  %1864 = vmatpush3.bf16.msra.mxu1 %v2051_v23 }
 0x10e   : > { %v510_v12 = vmax.f32 %v2372_v9, 0.0  ;;  %v520_v15 = vpack.c.bf16 %v512_v10, %v511_v13  ;;  %v2062_v9 = vld [vmem:[#allocation2 + $0xc0] sm:$0xff]  }
 0x110   : > { %v519_v14 = vpack.c.bf16 %v510_v12, %v509_v11 }
 0x112   : > { %1819 = vmatprep.mubr.bf16.mxu1 %v519_v14 }
 0x113   : > { %1820 = vmatmul.mubr.bf16.gmra.mxu1 %v520_v15 }
 0x1bb   : > { %v1809_v24 = vpop.f32.mrf.mxu1 }
 0x1bc   : > { %v635_v38 = vadd.f32 %v1809_v24, %v1627_v26 }
 0x1bd   : > { %v626_v25 = vpop.f32.mrf.mxu1 }
 0x1be   : > { %v627_v33 = vadd.f32 %v1627_v26, %v626_v25  ;;  %v691_v53 = vmax.f32 %v635_v38, 0.0 }
 0x1bf   : > { %v1810_v30 = vpop.f32.mrf.mxu1 }
 0x1c0   : > { %v638_v37 = vadd.f32 %v1810_v30, %v1627_v26  ;;  %v689_v51 = vmax.f32 %v627_v33, 0.0 }
 0x1c1   : > { %v629_v39 = vpop.f32.mrf.mxu1 }
 0x1c2   : > { %v630_v40 = vadd.f32 %v1627_v26, %v629_v39  ;;  %v692_v44 = vmax.f32 %v638_v37, 0.0 }
 0x1c3   : > { %v1813_v47 = vpop.f32.mrf.mxu1 }
 0x1c4   : > { %v690_v52 = vmax.f32 %v630_v40, 0.0  ;;  %v706_v61 = vpack.c.bf16 %v692_v44, %v691_v53  ;;  %v651_v4 = vadd.f32 %v1813_v47, %v1627_v26 }
 0x1c5   : > { %v642_v54 = vpop.f32.mrf.mxu1 }
 0x1c6   : > { %v705_v58 = vpack.c.bf16 %v690_v52, %v689_v51  ;;  %v643_v2 = vadd.f32 %v1627_v26, %v642_v54  ;;  %v695_v19 = vmax.f32 %v651_v4, 0.0 }
 0x1c7   : > { %v1814_v1 = vpop.f32.mrf.mxu1 }
 0x1c8   : > { %v654_v3 = vadd.f32 %v1814_v1, %v1627_v26  ;;  %1839 = vmatprep.mubr.bf16.mxu0 %v705_v58  ;;  %v693_v17 = vmax.f32 %v643_v2, 0.0 }
 0x1c9   : > { %v645_v8 = vpop.f32.mrf.mxu1  ;;  %1840 = vmatmul.mubr.bf16.vlgmr.msra.gmra.mxu0 %v706_v61 }
 0x1ca   : > { %v646_v14 = vadd.f32 %v1627_v26, %v645_v8  ;;  %v696_v15 = vmax.f32 %v654_v3, 0.0 }
 0x1cb   : > { %v1817_v16 = vpop.f32.mrf.mxu1 }
 0x1cc   : > { %v694_v18 = vmax.f32 %v646_v14, 0.0  ;;  %v708_v22 = vpack.c.bf16 %v696_v15, %v695_v19  ;;  %v667_v30 = vadd.f32 %v1817_v16, %v1627_v26  ;;  %v2053_v19 = vld [vmem:[#allocation2 + $0x88] sm:$0xff]  }
 0x1cd   : > { %v658_v20 = vpop.f32.mrf.mxu1 }
 0x1ce   : > { %v707_v21 = vpack.c.bf16 %v694_v18, %v693_v17  ;;  %v659_v24 = vadd.f32 %v1627_v26, %v658_v20  ;;  %v699_v47 = vmax.f32 %v667_v30, 0.0  ;;  %v2052_v18 = vld [vmem:[#allocation2 + $0x90] sm:$0xff]   ;;  %v2054_v20 = vld [vmem:[#allocation2 + $0x80] sm:$0xff]  }
 0x1cf   : > { %v1818_v23 = vpop.f32.mrf.mxu1  ;;  %1865 = vmatprep.subr.bf16.mxu1 %v2052_v18  ;;  %v2392_v30 = vld [vmem:[%s2633_s4 + $0x1] ss:$0 sm:$0xff] }
 0x1d0   : > { %v670_v25 = vadd.f32 %v1818_v23, %v1627_v26  ;;  %1843 = vmatprep.mubr.bf16.mxu0 %v707_v21  ;;  %v697_v40 = vmax.f32 %v659_v24, 0.0  ;;  %1866 = vmatpush3.bf16.msra.mxu1 %v2052_v18  ;;  %v2055_v21 = vld [vmem:[#allocation2 + $0xf8] sm:$0xff]   ;;  %v2058_v23 = vld [vmem:[#allocation2 + $0xe0] sm:$0xff]  }
 0x1d1   : > { %v661_v33 = vpop.f32.mrf.mxu1  ;;  %1844 = vmatmul.mubr.bf16.gmra.mxu0 %v708_v22  ;;  %1867 = vmatprep.subr.bf16.mxu1 %v2053_v19  ;;  %v2056_v22 = vld [vmem:[#allocation2 + $0xf0] sm:$0xff]   ;;  %v2059_v24 = vld [vmem:[#allocation2 + $0xd8] sm:$0xff]  }
 0x1d2   : > { %v662_v37 = vadd.f32 %v1627_v26, %v661_v33  ;;  %v700_v38 = vmax.f32 %v670_v25, 0.0  ;;  %1887 = vmatprep.subr.bf16.mxu0 %v2055_v21 }
 0x1d3   : > { %v1821_v39 = vpop.f32.mrf.mxu1  ;;  %1888 = vmatpush3.bf16.msra.mxu0 %v2055_v21 }
 0x1d4   : > { %v698_v44 = vmax.f32 %v662_v37, 0.0  ;;  %v710_v53 = vpack.c.bf16 %v700_v38, %v699_v47  ;;  %v683_v1 = vadd.f32 %v1821_v39, %v1627_v26  ;;  %1868 = vmatpush3.bf16.msra.mxu1 %v2053_v19  ;;  %1889 = vmatprep.subr.bf16.mxu0 %v2056_v22 }
 0x1d5   : > { %v674_v51 = vpop.f32.mrf.mxu1  ;;  %1869 = vmatprep.subr.bf16.mxu1 %v2054_v20 }
 0x1d6   : > { %v709_v52 = vpack.c.bf16 %v698_v44, %v697_v40  ;;  %v675_v58 = vadd.f32 %v1627_v26, %v674_v51  ;;  %v703_v15 = vmax.f32 %v683_v1, 0.0 }
 0x1d7   : > { %v1822_v54 = vpop.f32.mrf.mxu1  ;;  %1890 = vmatpush3.bf16.msra.mxu0 %v2056_v22 }
 0x1d8   : > { %v686_v61 = vadd.f32 %v1822_v54, %v1627_v26  ;;  %1847 = vmatprep.mubr.bf16.mxu0 %v709_v52  ;;  %v701_v8 = vmax.f32 %v675_v58, 0.0  ;;  %1870 = vmatpush3.bf16.msra.mxu1 %v2054_v20 }
 0x1d9   : > { %v677_v2 = vpop.f32.mrf.mxu1  ;;  %1848 = vmatmul.mubr.bf16.gmra.mxu0 %v710_v53  ;;  %1951 = vmatprep.subr.bf16.mxu1 %v2063_v7 }
 0x1da   : > { %v678_v3 = vadd.f32 %v1627_v26, %v677_v2  ;;  %v704_v4 = vmax.f32 %v686_v61, 0.0  ;;  %v2057_v26 = vld [vmem:[#allocation2 + $0xe8] sm:$0xff]  }
 0x1db   : > { %1891 = vmatprep.subr.bf16.mxu0 %v2057_v26 }
 0x1dc   : > { %v702_v14 = vmax.f32 %v678_v3, 0.0  ;;  %v712_v17 = vpack.c.bf16 %v704_v4, %v703_v15  ;;  %1892 = vmatpush3.bf16.msra.mxu0 %v2057_v26 }
 0x1dd   : > { %1893 = vmatprep.subr.bf16.mxu0 %v2058_v23 }
 0x1de   : > { %v711_v16 = vpack.c.bf16 %v702_v14, %v701_v8 }
 0x1e0   : > { %1851 = vmatprep.mubr.bf16.mxu0 %v711_v16  ;;  %1894 = vmatpush3.bf16.msra.mxu0 %v2058_v23 }
 0x1e1   : > { %1852 = vmatmul.mubr.bf16.gmra.mxu0 %v712_v17  ;;  %1895 = vmatprep.subr.bf16.mxu0 %v2059_v24 }
 0x1e4   : > { %1896 = vmatpush3.bf16.msra.mxu0 %v2059_v24 }
 0x289   : > { %v1841_v25 = vpop.f32.mrf.mxu0 }
 0x28a   : > { %v829_v38 = vadd.f32 %v1841_v25, %v2392_v30 }
 0x28b   : > { %v820_v33 = vpop.f32.mrf.mxu0 }
 0x28c   : > { %v821_v37 = vadd.f32 %v2392_v30, %v820_v33  ;;  %v885_v53 = vmax.f32 %v829_v38, 0.0 }
 0x28d   : > { %v1842_v39 = vpop.f32.mrf.mxu0 }
 0x28e   : > { %v832_v40 = vadd.f32 %v1842_v39, %v2392_v30  ;;  %v883_v47 = vmax.f32 %v821_v37, 0.0  ;;  %v2413_v8 = vadd.f32 %v885_v53, %v499_v36 }
 0x28f   : > { %v823_v44 = vpop.f32.mrf.mxu0 }
 0x290   : > { %v886_v51 = vmax.f32 %v832_v40, 0.0  ;;  %v824_v52 = vadd.f32 %v2392_v30, %v823_v44  ;;  %v2404_v2 = vadd.f32 %v883_v47, %v497_v34 }
 0x291   : > { %v1845_v54 = vpop.f32.mrf.mxu0 }
 0x292   : > { %v884_v58 = vmax.f32 %v824_v52, 0.0  ;;  %v2400_v61 = vadd.f32 %v886_v51, %v500_v32  ;;  %v845_v14 = vadd.f32 %v1845_v54, %v2392_v30 }
 0x293   : > { %v836_v1 = vpop.f32.mrf.mxu0 }
 0x294   : > { %v2408_v3 = vadd.f32 %v884_v58, %v498_v35  ;;  %v837_v4 = vadd.f32 %v2392_v30, %v836_v1  ;;  %v916_v34 = vpack.c.bf16 %v2400_v61, %v2413_v8  ;;  %v889_v29 = vmax.f32 %v845_v14, 0.0 }
 0x295   : > { %v1846_v28 = vpop.f32.mrf.mxu0 }
 0x296   : > { %v848_v32 = vadd.f32 %v1846_v28, %v2392_v30  ;;  %v915_v27 = vpack.c.bf16 %v2408_v3, %v2404_v2  ;;  %v887_v35 = vmax.f32 %v837_v4, 0.0  ;;  %v2437_v26 = vadd.f32 %v889_v29, %v503_v50 }
 0x297   : > { %v839_v31 = vpop.f32.mrf.mxu0 }
 0x298   : > { %v890_v15 = vmax.f32 %v848_v32, 0.0  ;;  %v840_v16 = vadd.f32 %v2392_v30, %v839_v31  ;;  %1871 = vmatprep.mubr.bf16.mxu1 %v915_v27  ;;  %v2428_v20 = vadd.f32 %v887_v35, %v501_v48  ;;  %v1647_v32 = vld [vmem:[%s2633_s4 + $0x2] ss:$0 sm:$0xff] }
 0x299   : > { %v1849_v36 = vpop.f32.mrf.mxu0  ;;  %1872 = vmatmul.mubr.bf16.vlgmr.msra.gmra.mxu1 %v916_v34 }
 0x29a   : > { %v888_v17 = vmax.f32 %v840_v16, 0.0  ;;  %v2424_v18 = vadd.f32 %v890_v15, %v504_v46  ;;  %v861_v23 = vadd.f32 %v1849_v36, %v2392_v30  ;;  %1959 = vmatpush3.bf16.msra.mxu1 %v2063_v7 }
 0x29b   : > { %v852_v19 = vpop.f32.mrf.mxu0 }
 0x29c   : > { %v2432_v21 = vadd.f32 %v888_v17, %v502_v49  ;;  %v853_v22 = vadd.f32 %v2392_v30, %v852_v19  ;;  %v918_v45 = vpack.c.bf16 %v2424_v18, %v2437_v26  ;;  %v893_v43 = vmax.f32 %v861_v23, 0.0 }
 0x29d   : > { %v1850_v42 = vpop.f32.mrf.mxu0 }
 0x29e   : > { %v864_v46 = vadd.f32 %v1850_v42, %v2392_v30  ;;  %v917_v41 = vpack.c.bf16 %v2432_v21, %v2428_v20  ;;  %v891_v49 = vmax.f32 %v853_v22, 0.0  ;;  %v2461_v47 = vadd.f32 %v893_v43, %v507_v0 }
 0x29f   : > { %v855_v48 = vpop.f32.mrf.mxu0 }
 0x2a0   : > { %v894_v24 = vmax.f32 %v864_v46, 0.0  ;;  %v856_v25 = vadd.f32 %v2392_v30, %v855_v48  ;;  %1875 = vmatprep.mubr.bf16.mxu1 %v917_v41  ;;  %v2452_v39 = vadd.f32 %v891_v49, %v505_v62 }
 0x2a1   : > { %v1853_v50 = vpop.f32.mrf.mxu0  ;;  %1876 = vmatmul.mubr.bf16.gmra.mxu1 %v918_v45 }
 0x2a2   : > { %v892_v33 = vmax.f32 %v856_v25, 0.0  ;;  %v2448_v37 = vadd.f32 %v894_v24, %v508_v60  ;;  %v877_v51 = vadd.f32 %v1853_v50, %v2392_v30 }
 0x2a3   : > { %v868_v38 = vpop.f32.mrf.mxu0 }
 0x2a4   : > { %v2456_v40 = vadd.f32 %v892_v33, %v506_v63  ;;  %v869_v44 = vadd.f32 %v2392_v30, %v868_v38  ;;  %v920_v59 = vpack.c.bf16 %v2448_v37, %v2461_v47  ;;  %v897_v57 = vmax.f32 %v877_v51, 0.0 }
 0x2a5   : > { %v1854_v56 = vpop.f32.mrf.mxu0 }
 0x2a6   : > { %v880_v60 = vadd.f32 %v1854_v56, %v2392_v30  ;;  %v919_v55 = vpack.c.bf16 %v2456_v40, %v2452_v39  ;;  %v895_v63 = vmax.f32 %v869_v44, 0.0  ;;  %v2484_v4 = vadd.f32 %v897_v57, %v511_v13  ;;  %v2066_v13 = vld [vmem:[%s2634_s5 + $0x20] sm:$0xff]  }
 0x2a7   : > { %v871_v62 = vpop.f32.mrf.mxu0 }
 0x2a8   : > { %v898_v52 = vmax.f32 %v880_v60, 0.0  ;;  %v872_v53 = vadd.f32 %v2392_v30, %v871_v62  ;;  %1879 = vmatprep.mubr.bf16.mxu1 %v919_v55  ;;  %v2476_v58 = vadd.f32 %v895_v63, %v509_v11  ;;  %v2064_v11 = vld [vmem:[%s2634_s5 + $0x30] sm:$0xff]  }
 0x2a9   : > { %1880 = vmatmul.mubr.bf16.gmra.mxu1 %v920_v59  ;;  %1952 = vmatprep.subr.bf16.mxu1 %v2064_v11 }
 0x2aa   : > { %v896_v0 = vmax.f32 %v872_v53, 0.0  ;;  %v2472_v54 = vadd.f32 %v898_v52, %v512_v10  ;;  %v2060_v10 = vld [vmem:[#allocation2 + $0xd0] sm:$0xff]   ;;  %1960 = vmatpush3.bf16.msra.mxu1 %v2064_v11 }
 0x2ab   : > { %1897 = vmatprep.subr.bf16.mxu0 %v2060_v10 }
 0x2ac   : > { %v2480_v1 = vadd.f32 %v896_v0, %v510_v12  ;;  %v922_v6 = vpack.c.bf16 %v2472_v54, %v2484_v4  ;;  %1898 = vmatpush3.bf16.msra.mxu0 %v2060_v10  ;;  %v2065_v12 = vld [vmem:[%s2634_s5 + $0x28] sm:$0xff]  }
 0x2ad   : > { %1899 = vmatprep.subr.bf16.mxu0 %v2061_v5  ;;  %1953 = vmatprep.subr.bf16.mxu1 %v2065_v12 }
 0x2ae   : > { %v921_v30 = vpack.c.bf16 %v2480_v1, %v2476_v58  ;;  %1961 = vmatpush3.bf16.msra.mxu1 %v2065_v12 }
 0x2af   : > { %1954 = vmatprep.subr.bf16.mxu1 %v2066_v13 }
 0x2b0   : > { %1883 = vmatprep.mubr.bf16.mxu1 %v921_v30  ;;  %1900 = vmatpush3.bf16.msra.mxu0 %v2061_v5 }
 0x2b1   : > { %1884 = vmatmul.mubr.bf16.gmra.mxu1 %v922_v6  ;;  %1901 = vmatprep.subr.bf16.mxu0 %v2062_v9 }
 0x2b2   : > { %1962 = vmatpush3.bf16.msra.mxu1 %v2066_v13 }
 0x2b4   : > { %1902 = vmatpush3.bf16.msra.mxu0 %v2062_v9 }
 0x2b5   : > { %1919 = vmatprep.subr.bf16.mxu0 %v2063_v7 }
 0x359   : > { %v1873_v14 = vpop.f32.mrf.mxu1 }
 0x35a   : > { %v1039_v35 = vadd.f32 %v1873_v14, %v1647_v32 }
 0x35b   : > { %v1030_v28 = vpop.f32.mrf.mxu1 }
 0x35c   : > { %v1031_v34 = vadd.f32 %v1647_v32, %v1030_v28  ;;  %v1095_v22 = vmax.f32 %v1039_v35, 0.0 }
 0x35d   : > { %v1874_v27 = vpop.f32.mrf.mxu1 }
 0x35e   : > { %v1042_v31 = vadd.f32 %v1874_v27, %v1647_v32  ;;  %v1093_v17 = vmax.f32 %v1031_v34, 0.0 }
 0x35f   : > { %v1033_v15 = vpop.f32.mrf.mxu1 }
 0x360   : > { %v1034_v16 = vadd.f32 %v1647_v32, %v1033_v15  ;;  %v1096_v29 = vmax.f32 %v1042_v31, 0.0 }
 0x361   : > { %v1877_v36 = vpop.f32.mrf.mxu1 }
 0x362   : > { %v1094_v19 = vmax.f32 %v1034_v16, 0.0  ;;  %v1110_v46 = vpack.c.bf16 %v1096_v29, %v1095_v22  ;;  %v1055_v49 = vadd.f32 %v1877_v36, %v1647_v32 }
 0x363   : > { %v1046_v23 = vpop.f32.mrf.mxu1 }
 0x364   : > { %v1109_v42 = vpack.c.bf16 %v1094_v19, %v1093_v17  ;;  %v1047_v48 = vadd.f32 %v1647_v32, %v1046_v23  ;;  %v1099_v44 = vmax.f32 %v1055_v49, 0.0  ;;  %v2069_v17 = vld [vmem:[%s2634_s5 + $0x8] sm:$0xff]   ;;  %v2070_v19 = vld [vmem:[%s2634_s5] sm:$0xff]  }
 0x365   : > { %v1878_v41 = vpop.f32.mrf.mxu1  ;;  %v2520_v23 = vld [vmem:[%s2633_s4 + $0x3] ss:$0 sm:$0xff] }
 0x366   : > { %v1058_v45 = vadd.f32 %v1878_v41, %v1647_v32  ;;  %1903 = vmatprep.mubr.bf16.mxu0 %v1109_v42  ;;  %v1097_v33 = vmax.f32 %v1047_v48, 0.0 }
 0x367   : > { %v1049_v24 = vpop.f32.mrf.mxu1  ;;  %1904 = vmatmul.mubr.bf16.vlgmr.msra.gmra.mxu0 %v1110_v46 }
 0x368   : > { %v1050_v25 = vadd.f32 %v1647_v32, %v1049_v24  ;;  %1920 = vmatpush3.bf16.msra.mxu0 %v2063_v7  ;;  %v1100_v43 = vmax.f32 %v1058_v45, 0.0 }
 0x369   : > { %v1881_v50 = vpop.f32.mrf.mxu1  ;;  %1921 = vmatprep.subr.bf16.mxu0 %v2064_v11 }
 0x36a   : > { %v1098_v38 = vmax.f32 %v1050_v25, 0.0  ;;  %v1112_v60 = vpack.c.bf16 %v1100_v43, %v1099_v44  ;;  %v1071_v63 = vadd.f32 %v1881_v50, %v1647_v32 }
 0x36b   : > { %v1062_v51 = vpop.f32.mrf.mxu1 }
 0x36c   : > { %v1111_v56 = vpack.c.bf16 %v1098_v38, %v1097_v33  ;;  %1922 = vmatpush3.bf16.msra.mxu0 %v2064_v11  ;;  %v1063_v62 = vadd.f32 %v1647_v32, %v1062_v51  ;;  %v1103_v10 = vmax.f32 %v1071_v63, 0.0 }
 0x36d   : > { %v1882_v55 = vpop.f32.mrf.mxu1  ;;  %1923 = vmatprep.subr.bf16.mxu0 %v2065_v12 }
 0x36e   : > { %v1074_v59 = vadd.f32 %v1882_v55, %v1647_v32  ;;  %1907 = vmatprep.mubr.bf16.mxu0 %v1111_v56  ;;  %v1101_v30 = vmax.f32 %v1063_v62, 0.0 }
 0x36f   : > { %v1065_v52 = vpop.f32.mrf.mxu1  ;;  %1908 = vmatmul.mubr.bf16.gmra.mxu0 %v1112_v60 }
 0x370   : > { %v1066_v53 = vadd.f32 %v1647_v32, %v1065_v52  ;;  %1924 = vmatpush3.bf16.msra.mxu0 %v2065_v12  ;;  %v1104_v57 = vmax.f32 %v1074_v59, 0.0 }
 0x371   : > { %v1885_v0 = vpop.f32.mrf.mxu1  ;;  %1925 = vmatprep.subr.bf16.mxu0 %v2066_v13 }
 0x372   : > { %v1102_v6 = vmax.f32 %v1066_v53, 0.0  ;;  %v1114_v7 = vpack.c.bf16 %v1104_v57, %v1103_v10  ;;  %v1087_v27 = vadd.f32 %v1885_v0, %v1647_v32 }
 0x373   : > { %v1078_v5 = vpop.f32.mrf.mxu1 }
 0x374   : > { %v1113_v9 = vpack.c.bf16 %v1102_v6, %v1101_v30  ;;  %1926 = vmatpush3.bf16.msra.mxu0 %v2066_v13  ;;  %v1079_v14 = vadd.f32 %v1647_v32, %v1078_v5  ;;  %v1107_v16 = vmax.f32 %v1087_v27, 0.0  ;;  %v2067_v13 = vld [vmem:[%s2634_s5 + $0x18] sm:$0xff]  }
 0x375   : > { %v1886_v11 = vpop.f32.mrf.mxu1  ;;  %1927 = vmatprep.subr.bf16.mxu0 %v2067_v13  ;;  %1955 = vmatprep.subr.bf16.mxu1 %v2067_v13 }
 0x376   : > { %v1090_v28 = vadd.f32 %v1886_v11, %v1647_v32  ;;  %1911 = vmatprep.mubr.bf16.mxu0 %v1113_v9  ;;  %v1105_v12 = vmax.f32 %v1079_v14, 0.0  ;;  %1963 = vmatpush3.bf16.msra.mxu1 %v2067_v13 }
 0x377   : > { %v1081_v34 = vpop.f32.mrf.mxu1  ;;  %1912 = vmatmul.mubr.bf16.gmra.mxu0 %v1114_v7 }
 0x378   : > { %v1082_v31 = vadd.f32 %v1647_v32, %v1081_v34  ;;  %v1108_v35 = vmax.f32 %v1090_v28, 0.0  ;;  %1928 = vmatpush3.bf16.msra.mxu0 %v2067_v13  ;;  %v2068_v32 = vld [vmem:[%s2634_s5 + $0x10] sm:$0xff]  }
 0x379   : > { %1929 = vmatprep.subr.bf16.mxu0 %v2068_v32  ;;  %1956 = vmatprep.subr.bf16.mxu1 %v2068_v32 }
 0x37a   : > { %v1106_v15 = vmax.f32 %v1082_v31, 0.0  ;;  %v1116_v36 = vpack.c.bf16 %v1108_v35, %v1107_v16  ;;  %1964 = vmatpush3.bf16.msra.mxu1 %v2068_v32 }
 0x37b   : > { %1957 = vmatprep.subr.bf16.mxu1 %v2069_v17 }
 0x37c   : > { %v1115_v29 = vpack.c.bf16 %v1106_v15, %v1105_v12  ;;  %1930 = vmatpush3.bf16.msra.mxu0 %v2068_v32 }
 0x37d   : > { %1931 = vmatprep.subr.bf16.mxu0 %v2069_v17 }
 0x37e   : > { %1915 = vmatprep.mubr.bf16.mxu0 %v1115_v29  ;;  %1965 = vmatpush3.bf16.msra.mxu1 %v2069_v17 }
 0x37f   : > { %1916 = vmatmul.mubr.bf16.gmra.mxu0 %v1116_v36  ;;  %1958 = vmatprep.subr.bf16.mxu1 %v2070_v19 }
 0x380   : > { %1932 = vmatpush3.bf16.msra.mxu0 %v2069_v17 }
 0x381   : > { %1933 = vmatprep.subr.bf16.mxu0 %v2070_v19 }
 0x382   : > { %1966 = vmatpush3.bf16.msra.mxu1 %v2070_v19 }
 0x384   : > { %1934 = vmatpush3.bf16.msra.mxu0 %v2070_v19 }
 0x427   : > { %v1905_v22 = vpop.f32.mrf.mxu0 }
 0x428   : > { %v1233_v41 = vadd.f32 %v1905_v22, %v2520_v23 }
 0x429   : > { %v1224_v42 = vpop.f32.mrf.mxu0 }
 0x42a   : > { %v1225_v46 = vadd.f32 %v2520_v23, %v1224_v42  ;;  %v1289_v50 = vmax.f32 %v1233_v41, 0.0 }
 0x42b   : > { %v1906_v48 = vpop.f32.mrf.mxu0 }
 0x42c   : > { %v1236_v45 = vadd.f32 %v1906_v48, %v2520_v23  ;;  %v1287_v24 = vmax.f32 %v1225_v46, 0.0  ;;  %v1305_v62 = vadd.f32 %v1289_v50, %v2413_v8 }
 0x42d   : > { %v1227_v49 = vpop.f32.mrf.mxu0 }
 0x42e   : > { %v1290_v25 = vmax.f32 %v1236_v45, 0.0  ;;  %v1228_v43 = vadd.f32 %v2520_v23, %v1227_v49  ;;  %v1303_v56 = vadd.f32 %v1287_v24, %v2404_v2 }
 0x42f   : > { %v1909_v33 = vpop.f32.mrf.mxu0 }
 0x430   : > { %v1288_v38 = vmax.f32 %v1228_v43, 0.0  ;;  %v1306_v44 = vadd.f32 %v1290_v25, %v2400_v61  ;;  %v1249_v59 = vadd.f32 %v1909_v33, %v2520_v23 }
 0x431   : > { %v1240_v51 = vpop.f32.mrf.mxu0 }
 0x432   : > { %v1304_v60 = vadd.f32 %v1288_v38, %v2408_v3  ;;  %v1241_v55 = vadd.f32 %v2520_v23, %v1240_v51  ;;  %v1320_v57 = vpack.c.bf16 %v1306_v44, %v1305_v62  ;;  %v1293_v2 = vmax.f32 %v1249_v59, 0.0 }
 0x433   : > { %v1910_v63 = vpop.f32.mrf.mxu0 }
 0x434   : > { %v1252_v52 = vadd.f32 %v1910_v63, %v2520_v23  ;;  %v1319_v53 = vpack.c.bf16 %v1304_v60, %v1303_v56  ;;  %v1291_v30 = vmax.f32 %v1241_v55, 0.0  ;;  %v1309_v14 = vadd.f32 %v1293_v2, %v2437_v26 }
 0x435   : > { %v1243_v0 = vpop.f32.mrf.mxu0 }
 0x436   : > { %v1294_v6 = vmax.f32 %v1252_v52, 0.0  ;;  %v1244_v61 = vadd.f32 %v2520_v23, %v1243_v0  ;;  %1935 = vmatprep.mubr.bf16.mxu0 %v1319_v53  ;;  %v1307_v9 = vadd.f32 %v1291_v30, %v2428_v20 }
 0x437   : > { %v1913_v10 = vpop.f32.mrf.mxu0  ;;  %1936 = vmatmul.mubr.bf16.vlgmr.msra.gmra.mxu0 %v1320_v57 }
 0x438   : > { %v1292_v3 = vmax.f32 %v1244_v61, 0.0  ;;  %v1310_v5 = vadd.f32 %v1294_v6, %v2424_v18  ;;  %v1265_v28 = vadd.f32 %v1913_v10, %v2520_v23 }
 0x439   : > { %v1256_v8 = vpop.f32.mrf.mxu0 }
 0x43a   : > { %v1308_v7 = vadd.f32 %v1292_v3, %v2432_v21  ;;  %v1257_v11 = vadd.f32 %v2520_v23, %v1256_v8  ;;  %v1322_v35 = vpack.c.bf16 %v1310_v5, %v1309_v14  ;;  %v1297_v20 = vmax.f32 %v1265_v28, 0.0 }
 0x43b   : > { %v1914_v27 = vpop.f32.mrf.mxu0 }
 0x43c   : > { %v1268_v34 = vadd.f32 %v1914_v27, %v2520_v23  ;;  %v1321_v31 = vpack.c.bf16 %v1308_v7, %v1307_v9  ;;  %v1295_v15 = vmax.f32 %v1257_v11, 0.0  ;;  %v1313_v19 = vadd.f32 %v1297_v20, %v2461_v47 }
 0x43d   : > { %v1259_v12 = vpop.f32.mrf.mxu0 }
 0x43e   : > { %v1298_v16 = vmax.f32 %v1268_v34, 0.0  ;;  %v1260_v18 = vadd.f32 %v2520_v23, %v1259_v12  ;;  %1939 = vmatprep.mubr.bf16.mxu1 %v1321_v31  ;;  %v1311_v13 = vadd.f32 %v1295_v15, %v2452_v39 }
 0x43f   : > { %v1917_v29 = vpop.f32.mrf.mxu0  ;;  %1940 = vmatmul.mubr.bf16.vlgmr.msra.gmra.mxu1 %v1322_v35 }
 0x440   : > { %v1296_v21 = vmax.f32 %v1260_v18, 0.0  ;;  %v1314_v36 = vadd.f32 %v1298_v16, %v2448_v37  ;;  %v1281_v22 = vadd.f32 %v1917_v29, %v2520_v23 }
 0x441   : > { %v1272_v26 = vpop.f32.mrf.mxu0 }
 0x442   : > { %v1312_v32 = vadd.f32 %v1296_v21, %v2456_v40  ;;  %v1273_v17 = vadd.f32 %v2520_v23, %v1272_v26  ;;  %v1324_v45 = vpack.c.bf16 %v1314_v36, %v1313_v19  ;;  %v1301_v40 = vmax.f32 %v1281_v22, 0.0 }
 0x443   : > { %v1918_v42 = vpop.f32.mrf.mxu0 }
 0x444   : > { %v1284_v46 = vadd.f32 %v1918_v42, %v2520_v23  ;;  %v1323_v41 = vpack.c.bf16 %v1312_v32, %v1311_v13  ;;  %v1299_v49 = vmax.f32 %v1273_v17, 0.0  ;;  %v1317_v50 = vadd.f32 %v1301_v40, %v2484_v4 }
 0x445   : > { %v1275_v48 = vpop.f32.mrf.mxu0 }
 0x446   : > { %v1302_v37 = vmax.f32 %v1284_v46, 0.0  ;;  %v1276_v39 = vadd.f32 %v2520_v23, %v1275_v48  ;;  %1943 = vmatprep.mubr.bf16.mxu1 %v1323_v41  ;;  %v1315_v25 = vadd.f32 %v1299_v49, %v2476_v58  ;;  %v1666_v23 = vld [vmem:[%s2635_s6] ss:$0 sm:$0xff] }
 0x447   : > { %1944 = vmatmul.mubr.bf16.gmra.mxu1 %v1324_v45 }
 0x448   : > { %v1300_v24 = vmax.f32 %v1276_v39, 0.0  ;;  %v1318_v47 = vadd.f32 %v1302_v37, %v2472_v54 }
 0x44a   : > { %v1316_v43 = vadd.f32 %v1300_v24, %v2480_v1  ;;  %v1326_v38 = vpack.c.bf16 %v1318_v47, %v1317_v50 }
 0x44c   : > { %v1325_v33 = vpack.c.bf16 %v1316_v43, %v1315_v25 }
 0x44e   : > { %1947 = vmatprep.mubr.bf16.mxu1 %v1325_v33 }
 0x44f   : > { %1948 = vmatmul.mubr.bf16.gmra.mxu1 %v1326_v38 }
 0x4f7   : > { %v1937_v44 = vpop.f32.mrf.mxu0 }
 0x4f8   : > { %v1441_v51 = vadd.f32 %v1937_v44, %v1666_v23 }
 0x4f9   : > { %v1432_v54 = vpop.f32.mrf.mxu0 }
 0x4fa   : > { %1497 = vst [vmem:[%s2560_s18 + $0x10] sm:$0xff] %v1441_v51  ;;  %v1433_v58 = vadd.f32 %v1666_v23, %v1432_v54 }
 0x4fb   : > { %v1938_v1 = vpop.f32.mrf.mxu0 }
 0x4fc   : > { %1495 = vst [vmem:[%s2560_s18] sm:$0xff] %v1433_v58  ;;  %v1444_v4 = vadd.f32 %v1938_v1, %v1666_v23 }
 0x4fd   : > { %v1435_v56 = vpop.f32.mrf.mxu0 }
 0x4fe   : > { %1498 = vst [vmem:[%s2560_s18 + $0x18] sm:$0xff] %v1444_v4  ;;  %v1436_v60 = vadd.f32 %v1666_v23, %v1435_v56 }
 0x4ff   : > { %v1941_v55 = vpop.f32.mrf.mxu1 }
 0x500   : > { %1496 = vst [vmem:[%s2560_s18 + $0x8] sm:$0xff] %v1436_v60  ;;  %v1457_v62 = vadd.f32 %v1941_v55, %v1666_v23 }
 0x501   : > { %v1448_v59 = vpop.f32.mrf.mxu1 }
 0x502   : > { %1501 = vst [vmem:[%s2560_s18 + $0x30] sm:$0xff] %v1457_v62  ;;  %v1449_v63 = vadd.f32 %v1666_v23, %v1448_v59 }
 0x503   : > { %v1942_v52 = vpop.f32.mrf.mxu1 }
 0x504   : > { %1499 = vst [vmem:[%s2560_s18 + $0x20] sm:$0xff] %v1449_v63  ;;  %v1460_v53 = vadd.f32 %v1942_v52, %v1666_v23 }
 0x505   : > { %v1451_v57 = vpop.f32.mrf.mxu1 }
 0x506   : > { %1502 = vst [vmem:[%s2560_s18 + $0x38] sm:$0xff] %v1460_v53  ;;  %v1452_v0 = vadd.f32 %v1666_v23, %v1451_v57 }
 0x507   : > { %v1945_v30 = vpop.f32.mrf.mxu1 }
 0x508   : > { %1500 = vst [vmem:[%s2560_s18 + $0x28] sm:$0xff] %v1452_v0  ;;  %v1473_v6 = vadd.f32 %v1945_v30, %v1666_v23 }
 0x509   : > { %v1464_v61 = vpop.f32.mrf.mxu1 }
 0x50a   : > { %1505 = vst [vmem:[%s2560_s18 + $0x50] sm:$0xff] %v1473_v6  ;;  %v1465_v2 = vadd.f32 %v1666_v23, %v1464_v61 }
 0x50b   : > { %v1946_v10 = vpop.f32.mrf.mxu1 }
 0x50c   : > { %1503 = vst [vmem:[%s2560_s18 + $0x40] sm:$0xff] %v1465_v2  ;;  %v1476_v3 = vadd.f32 %v1946_v10, %v1666_v23 }
 0x50d   : > { %v1467_v5 = vpop.f32.mrf.mxu1 }
 0x50e   : > { %1506 = vst [vmem:[%s2560_s18 + $0x58] sm:$0xff] %v1476_v3  ;;  %v1468_v8 = vadd.f32 %v1666_v23, %v1467_v5 }
 0x50f   : > { %v1949_v9 = vpop.f32.mrf.mxu1 }
 0x510   : > { %1504 = vst [vmem:[%s2560_s18 + $0x48] sm:$0xff] %v1468_v8  ;;  %v1489_v7 = vadd.f32 %v1949_v9, %v1666_v23 }
 0x511   : > { %v1480_v11 = vpop.f32.mrf.mxu1 }
 0x512   : > { %1509 = vst [vmem:[%s2560_s18 + $0x70] sm:$0xff] %v1489_v7  ;;  %v1481_v14 = vadd.f32 %v1666_v23, %v1480_v11 }
 0x513   : > { %v1950_v28 = vpop.f32.mrf.mxu1 }
 0x514   : > { %1507 = vst [vmem:[%s2560_s18 + $0x60] sm:$0xff] %v1481_v14  ;;  %v1492_v27 = vadd.f32 %v1950_v28, %v1666_v23 }
 0x515   : > { %v1483_v34 = vpop.f32.mrf.mxu1 }
 0x516   : > { %1510 = vst [vmem:[%s2560_s18 + $0x78] sm:$0xff] %v1492_v27  ;;  %v1484_v31 = vadd.f32 %v1666_v23, %v1483_v34 }
 0x518   : > { %1508 = vst [vmem:[%s2560_s18 + $0x68] sm:$0xff] %v1484_v31 }
 0x519   : > { %2110 = shalt.err (!%p2107_p0)
}
 0x51a   : > { %s2111_s13 = scalar_lea.hbm %s2581_s23, 2048  ;;  %s2115_s17 = scalar_lea.hbm %s2636_s7, 4096 }
 0x51b   : > { %p2112_p1 = scmp.ne.s32.totalorder %s2581_s23, %s2111_s13  ;;  %p2116_p4 = scmp.lt.s32.totalorder %s2581_s23, %s2636_s7 }
 0x51c   : > { %p2117_p7 = scmp.lt.s32.totalorder %s2115_s17, %s2111_s13 }
 0x51d   : > { %p2113_p2 = pnand %p2112_p1, %p2247_p5 }
 0x51e   : > { %p2118_p8 = por %p2117_p7, %p2116_p4 }
 0x51f   : > { %p2114_p3 = pneg %p2113_p2 }
 0x521   : > { %p2119_p6 = pnand %p2118_p8, %p2114_p3 }
 0x523   : > { %2122 = shalt.err (!%p2119_p6)
}
 0x524   : > { %s2167_s21 = smov 128   ;;  %s2168_s22 = smov 8  }
 0x525   : > { %1971 = dma.vmem_to_hbm [thread:$0]  (%p2247_p5), %s2583_s20, 2048, %s2581_s23, %s2589_s28, %s2167_s21, %s2167_s21, %s2168_s22  }
 0x526 PF: > { %p1983_p9 = scmp.ge.s32.totalorder %s2161_s27, 2  ;;  %s1540_s29 = sand.u32 1, %s2149_s24  }
 0x527   : > { %p2640_p10 = scmp.ne.s32.totalorder %s2638_s12, 0  ;;  %s1541_s8 = scalar_lea.sflag [#allocation4], %s1540_s29 }
 0x529   : > { %p1978_p11 = pnand %p1983_p9, %p2640_p10 }
 0x52b   : > { %p1979_p12 = pneg %p1978_p11 }
 0x52d   : > { %2144 = dma.done.wait (%p1979_p12), %s1541_s8, 2048  }
 0x52e   : > { %2146 = vsyncadd (%p1979_p12), %s1541_s8, 4294965248  ;;  %p18_p13 = scmp.ge.s32.totalorder %s2234_s30, 4   ;;  %s2641_s24 = smov %s2153_s25 }
 0x52f   : > { %s2642_s25 = smov %s2157_s26  ;;  %s2643_s26 = smov %s2245_s10 }
 0x530   : > { %s2644_s27 = smov %s2234_s30  ;;  %20 = sbr.rel (!%p18_p13) target bundleno = 4 (0x4), region = 94 }
 0x535   :  { %1546 = vsyncpa [#allocation3], 1 }
 0x536   :  { %1548 = vsyncpa [#allocation3 + $0x1], 1 }
 0x537   :  { %1549 = vsyncpa [#allocation4], 1 }
 0x538   :  { %1551 = vsyncpa [#allocation4 + $0x1], 1 }

</bundles_post_ra>
